<compile_context>
chip_gen: v5e
topology: v5e:2x2
jax: 0.10.0
libtpu: 0.0.40
codegen_flags: <defaults>
</compile_context>

<pallas_src>
import functools
import math

import jax
import jax.numpy as jnp
import numpy as np
from jax.experimental import pallas as pl
from jax.experimental.pallas import tpu as pltpu

_EPS = 1e-5  # nn.LayerNorm default eps


# ----------------------------- in-kernel helpers -----------------------------

def _layernorm(h, gamma, beta):
    """LayerNorm over the last axis with single-pass biased statistics."""
    m1 = jnp.mean(h, axis=-1, keepdims=True)
    m2 = jnp.mean(h * h, axis=-1, keepdims=True)
    var = m2 - m1 * m1
    return (h - m1) * jax.lax.rsqrt(var + _EPS) * gamma + beta


# --------------------------------- kernels ------------------------------------

def _embed_kernel(x_ref, pos_ref, o_ref):
    # x: (B, S, C); pos: (S, C) (positional embedding repeated over multiplex).
    o_ref[...] = (x_ref[...].astype(jnp.float32)
                  + pos_ref[...].astype(jnp.float32)[None, :, :]).astype(o_ref.dtype)


def _block_kernel(n_heads, x_ref, pvec_ref, w_attn_ref, w_ap_ref, w_fc_ref,
                  w_pj_ref, o_ref):
    """One TransformerBlock: x + MLP(LN(x)) + SelfAttention(LN(x))."""
    B, S, C = x_ref.shape
    H = n_heads
    HC = H * C

    x3 = x_ref[...].astype(jnp.float32)            # (B, S, C)
    xf = x3.reshape(B * S, C)                      # fold batch into rows (free)

    pv = pvec_ref[...].astype(jnp.float32)         # (6, Pmax) packed 1-D params
    gamma, beta = pv[0, :C], pv[1, :C]
    b_attn, b_ap = pv[2, :3 * HC], pv[3, :C]
    b_fc, b_pj = pv[4, :4 * C], pv[5, :C]

    # ---- LayerNorm ----------------------------------------------------------
    nxf = _layernorm(xf, gamma[None, :], beta[None, :])        # (B*S, C)

    # ---- Self-attention (head dim == n_channels, per the module) ------------
    qkv = jnp.dot(nxf, w_attn_ref[...],
                  preferred_element_type=jnp.float32) + b_attn[None, :]
    qkv3 = qkv.reshape(B, S, 3 * HC)
    w_ap = w_ap_ref[...]                                       # (HC, C)
    scale = 1.0 / math.sqrt(C)

    attn_out = jnp.zeros((B * S, C), jnp.float32)
    for h in range(H):                                         # static, small H
        qh = qkv3[:, :, h * C:(h + 1) * C]                     # (B, S, C)
        kh = qkv3[:, :, HC + h * C:HC + (h + 1) * C]
        vh = qkv3[:, :, 2 * HC + h * C:2 * HC + (h + 1) * C]
        logits = jnp.einsum('bqc,bkc->bqk', qh, kh,
                            preferred_element_type=jnp.float32) * scale
        logits = logits - jnp.max(logits, axis=-1, keepdims=True)
        p = jnp.exp(logits)
        p = p / jnp.sum(p, axis=-1, keepdims=True)
        oh = jnp.einsum('bqk,bkc->bqc', p, vh,
                        preferred_element_type=jnp.float32)    # (B, S, C)
        # fold this head's slice of the output projection (no lane concat)
        attn_out = attn_out + jnp.dot(oh.reshape(B * S, C),
                                      w_ap[h * C:(h + 1) * C, :],
                                      preferred_element_type=jnp.float32)
    attn_out = attn_out + b_ap[None, :]

    # ---- MLP (c_fc -> Swish -> c_proj) ---------------------------------------
    h1 = jnp.dot(nxf, w_fc_ref[...],
                 preferred_element_type=jnp.float32) + b_fc[None, :]
    h1 = h1 * jax.nn.sigmoid(h1)                               # Swish
    mlp = jnp.dot(h1, w_pj_ref[...],
                  preferred_element_type=jnp.float32) + b_pj[None, :]

    out = xf + mlp + attn_out                                  # residual
    o_ref[...] = out.reshape(B, S, C).astype(o_ref.dtype)


def _final_kernel(x_ref, lnp_ref, o_ref):
    # x: (B, T, M, C); lnp: (2, C) = [gamma; beta]; out: (B, T, C)
    x = x_ref[...].astype(jnp.float32)
    lnp = lnp_ref[...].astype(jnp.float32)
    y = _layernorm(x, lnp[0, :], lnp[1, :])
    o_ref[...] = jnp.sum(y, axis=2).astype(o_ref.dtype)


# --------------------------------- wrapper ------------------------------------

def pack_params(pos_emb, blocks_raw, ln_f_gamma, ln_f_beta, *, n_heads):
    """One-time repack of PyTorch-layout parameters: transpose Linear weights to
    (in, out) and merge the six 1-D per-layer parameters into one (6, Pmax) array."""
    packed_blocks = []
    for (ln_w, ln_b, ca_w, ca_b, ap_w, ap_b, fc_w, fc_b, pj_w, pj_b) in blocks_raw:
        C = ln_w.shape[0]
        pmax = max(C, 3 * n_heads * C, 4 * C)
        vecs = [ln_w, ln_b, ca_b, ap_b, fc_b, pj_b]
        pvec = jnp.stack([jnp.pad(v, (0, pmax - v.shape[0])) for v in vecs], axis=0)
        packed_blocks.append((pvec, ca_w.T, ap_w.T, fc_w.T, pj_w.T))
    lnp = jnp.stack([ln_f_gamma, ln_f_beta], axis=0)
    return {"pos_emb": pos_emb, "blocks": packed_blocks, "ln_f": lnp}


def multiplex_transformer_temporal_encoder(x, packed, *, n_heads):
    """x: (B, T, M, C) float32 -> (B, T, C)."""
    B, T, M, C = x.shape
    S = T * M
    vmem = pl.BlockSpec(memory_space=pltpu.MemorySpace.VMEM)

    # 1) positional embedding (Dropout is identity in eval mode)
    # TODO(synk): training-mode dropout (embed/attn/resid) is not implemented.
    pos_rep = jnp.repeat(packed["pos_emb"], M, axis=0)           # (S, C)
    xs = x.reshape(B, S, C).astype(jnp.float32)
    xs = pl.pallas_call(
        _embed_kernel,
        out_shape=jax.ShapeDtypeStruct((B, S, C), jnp.float32),
        in_specs=[vmem, vmem],
        out_specs=vmem,
    )(xs, pos_rep)

    # 2) transformer blocks (sequential dependence -> one pallas_call per layer)
    block_call = pl.pallas_call(
        functools.partial(_block_kernel, n_heads),
        out_shape=jax.ShapeDtypeStruct((B, S, C), jnp.float32),
        in_specs=[vmem] * 6,
        out_specs=vmem,
    )
    for (pvec, w_attn, w_ap, w_fc, w_pj) in packed["blocks"]:
        xs = block_call(xs, pvec, w_attn, w_ap, w_fc, w_pj)

    # 3) final LayerNorm + sum over the multiplex axis
    # TODO(synk): tile over T*M with a grid/BlockSpec once sequences outgrow VMEM.
    out = pl.pallas_call(
        _final_kernel,
        out_shape=jax.ShapeDtypeStruct((B, T, C), jnp.float32),
        in_specs=[vmem, vmem],
        out_specs=vmem,
    )(xs.reshape(B, T, M, C), packed["ln_f"])
    return out


# ------------------------------ pure-JAX reference ----------------------------

def _reference(x4, pos_emb, blocks_raw, ln_f_gamma, ln_f_beta, *, n_heads):
    B, T, M, C = x4.shape
    H, HC = n_heads, n_heads * C
    hi = jax.lax.Precision.HIGHEST

    def ln(h, g, b):
        m = h.mean(-1, keepdims=True)
        v = ((h - m) ** 2).mean(-1, keepdims=True)
        return (h - m) / jnp.sqrt(v + _EPS) * g + b

    x = x4 + pos_emb[None, :, None, :]
    x = x.reshape(B, T * M, C)
    for (ln_w, ln_b, ca_w, ca_b, ap_w, ap_b, fc_w, fc_b, pj_w, pj_b) in blocks_raw:
        nx = ln(x, ln_w, ln_b)
        att = jnp.einsum('bsc,dc->bsd', nx, ca_w, precision=hi) + ca_b
        q = att[:, :, 0 * HC:1 * HC].reshape(B, T * M, H, C).transpose(0, 2, 1, 3)
        k = att[:, :, 1 * HC:2 * HC].reshape(B, T * M, H, C).transpose(0, 2, 1, 3)
        v = att[:, :, 2 * HC:3 * HC].reshape(B, T * M, H, C).transpose(0, 2, 1, 3)
        a = jnp.einsum('bhqc,bhkc->bhqk', q, k, precision=hi) / math.sqrt(C)
        a = jax.nn.softmax(a, axis=-1)
        o = jnp.einsum('bhqk,bhkc->bhqc', a, v, precision=hi)
        o = o.transpose(0, 2, 1, 3).reshape(B, T * M, HC)
        attn_out = jnp.einsum('bsk,ck->bsc', o, ap_w, precision=hi) + ap_b
        h1 = jnp.einsum('bsc,dc->bsd', nx, fc_w, precision=hi) + fc_b
        h1 = h1 * jax.nn.sigmoid(h1)
        mlp = jnp.einsum('bsd,cd->bsc', h1, pj_w, precision=hi) + pj_b
        x = x + mlp + attn_out
    x = ln(x, ln_f_gamma, ln_f_beta)
    return x.reshape(B, T, M, C).sum(axis=2)


# ----------------------------------- main -------------------------------------

if __name__ == "__main__":
    B, T, M, C, H, L = 2, 8, 2, 32, 2, 2          # batch, n_times, n_mplex, n_channels, n_heads, n_layers
    HC = H * C
    key = jax.random.PRNGKey(0)

    def nrm(k, shape, scale=1.0):
        return scale * jax.random.normal(k, shape, jnp.float32)

    ks = iter(jax.random.split(key, 4 + 10 * L))

    x = nrm(next(ks), (B, T, M, C))
    pos_emb = nrm(next(ks), (T, C), 0.02)

    blocks_raw = []
    for _ in range(L):
        blocks_raw.append((
            1.0 + nrm(next(ks), (C,), 0.1),        # LayerNorm weight
            nrm(next(ks), (C,), 0.1),              # LayerNorm bias
            nrm(next(ks), (3 * HC, C), 0.2),       # c_attn weight (out, in)
            nrm(next(ks), (3 * HC,), 0.05),        # c_attn bias
            nrm(next(ks), (C, HC), 0.2),           # attn c_proj weight
            nrm(next(ks), (C,), 0.05),             # attn c_proj bias
            nrm(next(ks), (4 * C, C), 0.2),        # c_fc weight
            nrm(next(ks), (4 * C,), 0.05),         # c_fc bias
            nrm(next(ks), (C, 4 * C), 0.2),        # mlp c_proj weight
            nrm(next(ks), (C,), 0.05),             # mlp c_proj bias
        ))
    ln_f_gamma = 1.0 + nrm(next(ks), (C,), 0.1)
    ln_f_beta = nrm(next(ks), (C,), 0.1)

    packed = pack_params(pos_emb, blocks_raw, ln_f_gamma, ln_f_beta, n_heads=H)
    fwd = jax.jit(functools.partial(multiplex_transformer_temporal_encoder,
                                    n_heads=H))
    out = jax.block_until_ready(fwd(x, packed))

    ref = jax.block_until_ready(
        _reference(x, pos_emb, blocks_raw, ln_f_gamma, ln_f_beta, n_heads=H))
    np.testing.assert_allclose(np.asarray(out), np.asarray(ref),
                               rtol=2e-3, atol=2e-3)
    print("KERNEL_OK")
</pallas_src>

<mosaic_0001>
module attributes {stable_mosaic.version = 11 : i64} {
  func.func @_embed_kernel(%arg0: memref<2x16x32xf32, #tpu.memory_space<vmem>>, %arg1: memref<16x32xf32, #tpu.memory_space<vmem>>, %arg2: memref<2x16x32xf32, #tpu.memory_space<vmem>>) attributes {dimension_semantics = [], scalar_prefetch = 0 : i64, scratch_operands = 0 : i64, tpu.core_type = #tpu.core_type<tc>} {
    %c0 = arith.constant 0 : index
    %c0_0 = arith.constant 0 : index
    %c0_1 = arith.constant 0 : index
    %0 = vector.load %arg0[%c0, %c0_0, %c0_1] : memref<2x16x32xf32, #tpu.memory_space<vmem>>, vector<2x16x32xf32>
    %c0_2 = arith.constant 0 : index
    %c0_3 = arith.constant 0 : index
    %1 = vector.load %arg1[%c0_2, %c0_3] : memref<16x32xf32, #tpu.memory_space<vmem>>, vector<16x32xf32>
    %2 = vector.shape_cast %1 : vector<16x32xf32> to vector<1x16x32xf32>
    %3 = vector.broadcast %2 : vector<1x16x32xf32> to vector<2x16x32xf32>
    %4 = arith.addf %0, %3 : vector<2x16x32xf32>
    %c0_4 = arith.constant 0 : index
    %c0_5 = arith.constant 0 : index
    %c0_6 = arith.constant 0 : index
    %5 = vector.load %arg2[%c0_4, %c0_5, %c0_6] : memref<2x16x32xf32, #tpu.memory_space<vmem>>, vector<2x16x32xf32>
    tpu.vector_store %arg2[%c0_4, %c0_5, %c0_6], %4 {strides = array<i32>} : memref<2x16x32xf32, #tpu.memory_space<vmem>>, vector<2x16x32xf32>,
    return
  }
}

module attributes {stable_mosaic.version = 11 : i64} {
  func.func @_block_kernel(%arg0: memref<2x16x32xf32, #tpu.memory_space<vmem>>, %arg1: memref<6x192xf32, #tpu.memory_space<vmem>>, %arg2: memref<32x192xf32, #tpu.memory_space<vmem>>, %arg3: memref<64x32xf32, #tpu.memory_space<vmem>>, %arg4: memref<32x128xf32, #tpu.memory_space<vmem>>, %arg5: memref<128x32xf32, #tpu.memory_space<vmem>>, %arg6: memref<2x16x32xf32, #tpu.memory_space<vmem>>) attributes {dimension_semantics = [], scalar_prefetch = 0 : i64, scratch_operands = 0 : i64, tpu.core_type = #tpu.core_type<tc>} {
    %c0 = arith.constant 0 : index
    %c0_0 = arith.constant 0 : index
    %c0_1 = arith.constant 0 : index
    %0 = vector.load %arg0[%c0, %c0_0, %c0_1] : memref<2x16x32xf32, #tpu.memory_space<vmem>>, vector<2x16x32xf32>
    %1 = vector.shape_cast %0 : vector<2x16x32xf32> to vector<32x32xf32>
    %c0_2 = arith.constant 0 : index
    %c0_3 = arith.constant 0 : index
    %2 = vector.load %arg1[%c0_2, %c0_3] : memref<6x192xf32, #tpu.memory_space<vmem>>, vector<6x192xf32>
    %3 = vector.extract_strided_slice %2 {offsets = [0, 0], sizes = [1, 32], strides = [1, 1]} : vector<6x192xf32> to vector<1x32xf32>
    %4 = vector.shape_cast %3 : vector<1x32xf32> to vector<32xf32>
    %5 = vector.extract_strided_slice %2 {offsets = [1, 0], sizes = [1, 32], strides = [1, 1]} : vector<6x192xf32> to vector<1x32xf32>
    %6 = vector.shape_cast %5 : vector<1x32xf32> to vector<32xf32>
    %7 = vector.extract_strided_slice %2 {offsets = [2, 0], sizes = [1, 192], strides = [1, 1]} : vector<6x192xf32> to vector<1x192xf32>
    %8 = vector.shape_cast %7 : vector<1x192xf32> to vector<192xf32>
    %9 = vector.extract_strided_slice %2 {offsets = [3, 0], sizes = [1, 32], strides = [1, 1]} : vector<6x192xf32> to vector<1x32xf32>
    %10 = vector.shape_cast %9 : vector<1x32xf32> to vector<32xf32>
    %11 = vector.extract_strided_slice %2 {offsets = [4, 0], sizes = [1, 128], strides = [1, 1]} : vector<6x192xf32> to vector<1x128xf32>
    %12 = vector.shape_cast %11 : vector<1x128xf32> to vector<128xf32>
    %13 = vector.extract_strided_slice %2 {offsets = [5, 0], sizes = [1, 32], strides = [1, 1]} : vector<6x192xf32> to vector<1x32xf32>
    %14 = vector.shape_cast %13 : vector<1x32xf32> to vector<32xf32>
    %15 = vector.shape_cast %4 : vector<32xf32> to vector<1x32xf32>
    %16 = vector.shape_cast %6 : vector<32xf32> to vector<1x32xf32>
    %cst = arith.constant dense<0.000000e+00> : vector<32xf32>
    %17 = vector.multi_reduction <add>, %1, %cst [1] : vector<32x32xf32> to vector<32xf32>
    %18 = vector.shape_cast %17 : vector<32xf32> to vector<32x1xf32>
    %cst_4 = arith.constant 3.200000e+01 : f32
    %19 = vector.broadcast %cst_4 : f32 to vector<32x1xf32>
    %20 = arith.divf %18, %19 : vector<32x1xf32>
    %21 = arith.mulf %1, %1 : vector<32x32xf32>
    %cst_5 = arith.constant dense<0.000000e+00> : vector<32xf32>
    %22 = vector.multi_reduction <add>, %21, %cst_5 [1] : vector<32x32xf32> to vector<32xf32>
    %23 = vector.shape_cast %22 : vector<32xf32> to vector<32x1xf32>
    %cst_6 = arith.constant 3.200000e+01 : f32
    %24 = vector.broadcast %cst_6 : f32 to vector<32x1xf32>
    %25 = arith.divf %23, %24 : vector<32x1xf32>
    %26 = arith.mulf %20, %20 : vector<32x1xf32>
    %27 = arith.subf %25, %26 : vector<32x1xf32>
    %28 = vector.broadcast %20 : vector<32x1xf32> to vector<32x32xf32>
    %29 = arith.subf %1, %28 : vector<32x32xf32>
    %cst_7 = arith.constant 9.99999974E-6 : f32
    %30 = vector.broadcast %cst_7 : f32 to vector<32x1xf32>
    %31 = arith.addf %27, %30 : vector<32x1xf32>
    %32 = math.rsqrt %31 : vector<32x1xf32>
    %33 = vector.broadcast %32 : vector<32x1xf32> to vector<32x32xf32>
    %34 = arith.mulf %29, %33 : vector<32x32xf32>
    %35 = vector.broadcast %15 : vector<1x32xf32> to vector<32x32xf32>
    %36 = arith.mulf %34, %35 : vector<32x32xf32>
    %37 = vector.broadcast %16 : vector<1x32xf32> to vector<32x32xf32>
    %38 = arith.addf %36, %37 : vector<32x32xf32>
    %c0_8 = arith.constant 0 : index
    %c0_9 = arith.constant 0 : index
    %39 = vector.load %arg2[%c0_8, %c0_9] : memref<32x192xf32, #tpu.memory_space<vmem>>, vector<32x192xf32>
    %cst_10 = arith.constant dense<0.000000e+00> : vector<32x192xf32>
    %40 = tpu.matmul %38, %39, %cst_10 {dimension_numbers = #tpu.dot_dimension_numbers<[1], [0], [0], [1], [0, 0, 1, 1], [], []>} : vector<32x32xf32>, vector<32x192xf32>, vector<32x192xf32> -> vector<32x192xf32>
    %41 = vector.shape_cast %8 : vector<192xf32> to vector<1x192xf32>
    %42 = vector.broadcast %41 : vector<1x192xf32> to vector<32x192xf32>
    %43 = arith.addf %40, %42 : vector<32x192xf32>
    %44 = vector.shape_cast %43 : vector<32x192xf32> to vector<2x16x192xf32>
    %c0_11 = arith.constant 0 : index
    %c0_12 = arith.constant 0 : index
    %45 = vector.load %arg3[%c0_11, %c0_12] : memref<64x32xf32, #tpu.memory_space<vmem>>, vector<64x32xf32>
    %cst_13 = arith.constant 0.000000e+00 : f32
    %46 = vector.broadcast %cst_13 : f32 to vector<32x32xf32>
    %47 = vector.extract_strided_slice %44 {offsets = [0, 0, 0], sizes = [2, 16, 32], strides = [1, 1, 1]} : vector<2x16x192xf32> to vector<2x16x32xf32>
    %48 = vector.extract_strided_slice %44 {offsets = [0, 0, 64], sizes = [2, 16, 32], strides = [1, 1, 1]} : vector<2x16x192xf32> to vector<2x16x32xf32>
    %49 = vector.extract_strided_slice %44 {offsets = [0, 0, 128], sizes = [2, 16, 32], strides = [1, 1, 1]} : vector<2x16x192xf32> to vector<2x16x32xf32>
    "tpu.trace_start"() <{level = 10 : i32, message = "bqc,bkc->bqk"}> : () -> ()
    %cst_14 = arith.constant dense<0.000000e+00> : vector<2x16x16xf32>
    %50 = tpu.matmul %47, %48, %cst_14 {dimension_numbers = #tpu.dot_dimension_numbers<[2], [2], [1], [1], [0, 0, 0, 1, 1, 1], [0], [0]>} : vector<2x16x32xf32>, vector<2x16x32xf32>, vector<2x16x16xf32> -> vector<2x16x16xf32>
    "tpu.trace_stop"() : () -> ()
    %cst_15 = arith.constant 0.176776692 : f32
    %51 = vector.broadcast %cst_15 : f32 to vector<2x16x16xf32>
    %52 = arith.mulf %50, %51 : vector<2x16x16xf32>
    %cst_16 = arith.constant dense<0xFF800000> : vector<2x16xf32>
    %53 = vector.multi_reduction <maximumf>, %52, %cst_16 [2] : vector<2x16x16xf32> to vector<2x16xf32>
    %54 = vector.shape_cast %53 : vector<2x16xf32> to vector<2x16x1xf32>
    %55 = vector.broadcast %54 : vector<2x16x1xf32> to vector<2x16x16xf32>
    %56 = arith.subf %52, %55 : vector<2x16x16xf32>
    %57 = math.exp %56 : vector<2x16x16xf32>
    %cst_17 = arith.constant dense<0.000000e+00> : vector<2x16xf32>
    %58 = vector.multi_reduction <add>, %57, %cst_17 [2] : vector<2x16x16xf32> to vector<2x16xf32>
    %59 = vector.shape_cast %58 : vector<2x16xf32> to vector<2x16x1xf32>
    %60 = vector.broadcast %59 : vector<2x16x1xf32> to vector<2x16x16xf32>
    %61 = arith.divf %57, %60 : vector<2x16x16xf32>
    "tpu.trace_start"() <{level = 10 : i32, message = "bqk,bkc->bqc"}> : () -> ()
    %cst_18 = arith.constant dense<0.000000e+00> : vector<2x16x32xf32>
    %62 = tpu.matmul %61, %49, %cst_18 {dimension_numbers = #tpu.dot_dimension_numbers<[2], [1], [1], [2], [0, 0, 0, 1, 1, 2], [0], [0]>} : vector<2x16x16xf32>, vector<2x16x32xf32>, vector<2x16x32xf32> -> vector<2x16x32xf32>
    "tpu.trace_stop"() : () -> ()
    %63 = vector.shape_cast %62 : vector<2x16x32xf32> to vector<32x32xf32>
    %64 = vector.extract_strided_slice %45 {offsets = [0, 0], sizes = [32, 32], strides = [1, 1]} : vector<64x32xf32> to vector<32x32xf32>
    %cst_19 = arith.constant dense<0.000000e+00> : vector<32x32xf32>
    %65 = tpu.matmul %63, %64, %cst_19 {dimension_numbers = #tpu.dot_dimension_numbers<[1], [0], [0], [1], [0, 0, 1, 1], [], []>} : vector<32x32xf32>, vector<32x32xf32>, vector<32x32xf32> -> vector<32x32xf32>
    %66 = arith.addf %46, %65 : vector<32x32xf32>
    %67 = vector.extract_strided_slice %44 {offsets = [0, 0, 32], sizes = [2, 16, 32], strides = [1, 1, 1]} : vector<2x16x192xf32> to vector<2x16x32xf32>
    %68 = vector.extract_strided_slice %44 {offsets = [0, 0, 96], sizes = [2, 16, 32], strides = [1, 1, 1]} : vector<2x16x192xf32> to vector<2x16x32xf32>
    %69 = vector.extract_strided_slice %44 {offsets = [0, 0, 160], sizes = [2, 16, 32], strides = [1, 1, 1]} : vector<2x16x192xf32> to vector<2x16x32xf32>
    "tpu.trace_start"() <{level = 10 : i32, message = "bqc,bkc->bqk"}> : () -> ()
    %cst_20 = arith.constant dense<0.000000e+00> : vector<2x16x16xf32>
    %70 = tpu.matmul %67, %68, %cst_20 {dimension_numbers = #tpu.dot_dimension_numbers<[2], [2], [1], [1], [0, 0, 0, 1, 1, 1], [0], [0]>} : vector<2x16x32xf32>, vector<2x16x32xf32>, vector<2x16x16xf32> -> vector<2x16x16xf32>
    "tpu.trace_stop"() : () -> ()
    %cst_21 = arith.constant 0.176776692 : f32
    %71 = vector.broadcast %cst_21 : f32 to vector<2x16x16xf32>
    %72 = arith.mulf %70, %71 : vector<2x16x16xf32>
    %cst_22 = arith.constant dense<0xFF800000> : vector<2x16xf32>
    %73 = vector.multi_reduction <maximumf>, %72, %cst_22 [2] : vector<2x16x16xf32> to vector<2x16xf32>
    %74 = vector.shape_cast %73 : vector<2x16xf32> to vector<2x16x1xf32>
    %75 = vector.broadcast %74 : vector<2x16x1xf32> to vector<2x16x16xf32>
    %76 = arith.subf %72, %75 : vector<2x16x16xf32>
    %77 = math.exp %76 : vector<2x16x16xf32>
    %cst_23 = arith.constant dense<0.000000e+00> : vector<2x16xf32>
    %78 = vector.multi_reduction <add>, %77, %cst_23 [2] : vector<2x16x16xf32> to vector<2x16xf32>
    %79 = vector.shape_cast %78 : vector<2x16xf32> to vector<2x16x1xf32>
    %80 = vector.broadcast %79 : vector<2x16x1xf32> to vector<2x16x16xf32>
    %81 = arith.divf %77, %80 : vector<2x16x16xf32>
    "tpu.trace_start"() <{level = 10 : i32, message = "bqk,bkc->bqc"}> : () -> ()
    %cst_24 = arith.constant dense<0.000000e+00> : vector<2x16x32xf32>
    %82 = tpu.matmul %81, %69, %cst_24 {dimension_numbers = #tpu.dot_dimension_numbers<[2], [1], [1], [2], [0, 0, 0, 1, 1, 2], [0], [0]>} : vector<2x16x16xf32>, vector<2x16x32xf32>, vector<2x16x32xf32> -> vector<2x16x32xf32>
    "tpu.trace_stop"() : () -> ()
    %83 = vector.shape_cast %82 : vector<2x16x32xf32> to vector<32x32xf32>
    %84 = vector.extract_strided_slice %45 {offsets = [32, 0], sizes = [32, 32], strides = [1, 1]} : vector<64x32xf32> to vector<32x32xf32>
    %cst_25 = arith.constant dense<0.000000e+00> : vector<32x32xf32>
    %85 = tpu.matmul %83, %84, %cst_25 {dimension_numbers = #tpu.dot_dimension_numbers<[1], [0], [0], [1], [0, 0, 1, 1], [], []>} : vector<32x32xf32>, vector<32x32xf32>, vector<32x32xf32> -> vector<32x32xf32>
    %86 = arith.addf %66, %85 : vector<32x32xf32>
    %87 = vector.shape_cast %10 : vector<32xf32> to vector<1x32xf32>
    %88 = vector.broadcast %87 : vector<1x32xf32> to vector<32x32xf32>
    %89 = arith.addf %86, %88 : vector<32x32xf32>
    %c0_26 = arith.constant 0 : index
    %c0_27 = arith.constant 0 : index
    %90 = vector.load %arg4[%c0_26, %c0_27] : memref<32x128xf32, #tpu.memory_space<vmem>>, vector<32x128xf32>
    %cst_28 = arith.constant dense<0.000000e+00> : vector<32x128xf32>
    %91 = tpu.matmul %38, %90, %cst_28 {dimension_numbers = #tpu.dot_dimension_numbers<[1], [0], [0], [1], [0, 0, 1, 1], [], []>} : vector<32x32xf32>, vector<32x128xf32>, vector<32x128xf32> -> vector<32x128xf32>
    %92 = vector.shape_cast %12 : vector<128xf32> to vector<1x128xf32>
    %93 = vector.broadcast %92 : vector<1x128xf32> to vector<32x128xf32>
    %94 = arith.addf %91, %93 : vector<32x128xf32>
    %95 = arith.negf %94 : vector<32x128xf32>
    %96 = math.exp %95 : vector<32x128xf32>
    %cst_29 = arith.constant 1.000000e+00 : f32
    %97 = vector.broadcast %cst_29 : f32 to vector<32x128xf32>
    %98 = arith.addf %97, %96 : vector<32x128xf32>
    %99 = arith.divf %97, %98 : vector<32x128xf32>
    %100 = arith.mulf %94, %99 : vector<32x128xf32>
    %c0_30 = arith.constant 0 : index
    %c0_31 = arith.constant 0 : index
    %101 = vector.load %arg5[%c0_30, %c0_31] : memref<128x32xf32, #tpu.memory_space<vmem>>, vector<128x32xf32>
    %cst_32 = arith.constant dense<0.000000e+00> : vector<32x32xf32>
    %102 = tpu.matmul %100, %101, %cst_32 {dimension_numbers = #tpu.dot_dimension_numbers<[1], [0], [0], [1], [0, 0, 1, 1], [], []>} : vector<32x128xf32>, vector<128x32xf32>, vector<32x32xf32> -> vector<32x32xf32>
    %103 = vector.shape_cast %14 : vector<32xf32> to vector<1x32xf32>
    %104 = vector.broadcast %103 : vector<1x32xf32> to vector<32x32xf32>
    %105 = arith.addf %102, %104 : vector<32x32xf32>
    %106 = arith.addf %1, %105 : vector<32x32xf32>
    %107 = arith.addf %106, %89 : vector<32x32xf32>
    %108 = vector.shape_cast %107 : vector<32x32xf32> to vector<2x16x32xf32>
    %c0_33 = arith.constant 0 : index
    %c0_34 = arith.constant 0 : index
    %c0_35 = arith.constant 0 : index
    %109 = vector.load %arg6[%c0_33, %c0_34, %c0_35] : memref<2x16x32xf32, #tpu.memory_space<vmem>>, vector<2x16x32xf32>
    tpu.vector_store %arg6[%c0_33, %c0_34, %c0_35], %108 {strides = array<i32>} : memref<2x16x32xf32, #tpu.memory_space<vmem>>, vector<2x16x32xf32>,
    return
  }
}

module attributes {stable_mosaic.version = 11 : i64} {
  func.func @_final_kernel(%arg0: memref<2x8x2x32xf32, #tpu.memory_space<vmem>>, %arg1: memref<2x32xf32, #tpu.memory_space<vmem>>, %arg2: memref<2x8x32xf32, #tpu.memory_space<vmem>>) attributes {dimension_semantics = [], scalar_prefetch = 0 : i64, scratch_operands = 0 : i64, tpu.core_type = #tpu.core_type<tc>} {
    %c0 = arith.constant 0 : index
    %c0_0 = arith.constant 0 : index
    %c0_1 = arith.constant 0 : index
    %c0_2 = arith.constant 0 : index
    %0 = vector.load %arg0[%c0, %c0_0, %c0_1, %c0_2] : memref<2x8x2x32xf32, #tpu.memory_space<vmem>>, vector<2x8x2x32xf32>
    %c0_3 = arith.constant 0 : index
    %c0_4 = arith.constant 0 : index
    %1 = vector.load %arg1[%c0_3, %c0_4] : memref<2x32xf32, #tpu.memory_space<vmem>>, vector<2x32xf32>
    %2 = vector.extract_strided_slice %1 {offsets = [0, 0], sizes = [1, 32], strides = [1, 1]} : vector<2x32xf32> to vector<1x32xf32>
    %3 = vector.shape_cast %2 : vector<1x32xf32> to vector<32xf32>
    %4 = vector.extract_strided_slice %1 {offsets = [1, 0], sizes = [1, 32], strides = [1, 1]} : vector<2x32xf32> to vector<1x32xf32>
    %5 = vector.shape_cast %4 : vector<1x32xf32> to vector<32xf32>
    %cst = arith.constant dense<0.000000e+00> : vector<2x8x2xf32>
    %6 = vector.multi_reduction <add>, %0, %cst [3] : vector<2x8x2x32xf32> to vector<2x8x2xf32>
    %7 = vector.shape_cast %6 : vector<2x8x2xf32> to vector<2x8x2x1xf32>
    %cst_5 = arith.constant 3.200000e+01 : f32
    %8 = vector.broadcast %cst_5 : f32 to vector<2x8x2x1xf32>
    %9 = arith.divf %7, %8 : vector<2x8x2x1xf32>
    %10 = arith.mulf %0, %0 : vector<2x8x2x32xf32>
    %cst_6 = arith.constant dense<0.000000e+00> : vector<2x8x2xf32>
    %11 = vector.multi_reduction <add>, %10, %cst_6 [3] : vector<2x8x2x32xf32> to vector<2x8x2xf32>
    %12 = vector.shape_cast %11 : vector<2x8x2xf32> to vector<2x8x2x1xf32>
    %cst_7 = arith.constant 3.200000e+01 : f32
    %13 = vector.broadcast %cst_7 : f32 to vector<2x8x2x1xf32>
    %14 = arith.divf %12, %13 : vector<2x8x2x1xf32>
    %15 = arith.mulf %9, %9 : vector<2x8x2x1xf32>
    %16 = arith.subf %14, %15 : vector<2x8x2x1xf32>
    %17 = vector.broadcast %9 : vector<2x8x2x1xf32> to vector<2x8x2x32xf32>
    %18 = arith.subf %0, %17 : vector<2x8x2x32xf32>
    %cst_8 = arith.constant 9.99999974E-6 : f32
    %19 = vector.broadcast %cst_8 : f32 to vector<2x8x2x1xf32>
    %20 = arith.addf %16, %19 : vector<2x8x2x1xf32>
    %21 = math.rsqrt %20 : vector<2x8x2x1xf32>
    %22 = vector.broadcast %21 : vector<2x8x2x1xf32> to vector<2x8x2x32xf32>
    %23 = arith.mulf %18, %22 : vector<2x8x2x32xf32>
    %24 = vector.shape_cast %3 : vector<32xf32> to vector<1x1x1x32xf32>
    %25 = vector.broadcast %24 : vector<1x1x1x32xf32> to vector<2x8x2x32xf32>
    %26 = arith.mulf %23, %25 : vector<2x8x2x32xf32>
    %27 = vector.shape_cast %5 : vector<32xf32> to vector<1x1x1x32xf32>
    %28 = vector.broadcast %27 : vector<1x1x1x32xf32> to vector<2x8x2x32xf32>
    %29 = arith.addf %26, %28 : vector<2x8x2x32xf32>
    %cst_9 = arith.constant dense<0.000000e+00> : vector<2x8x32xf32>
    %30 = vector.multi_reduction <add>, %29, %cst_9 [2] : vector<2x8x2x32xf32> to vector<2x8x32xf32>
    %c0_10 = arith.constant 0 : index
    %c0_11 = arith.constant 0 : index
    %c0_12 = arith.constant 0 : index
    %31 = vector.load %arg2[%c0_10, %c0_11, %c0_12] : memref<2x8x32xf32, #tpu.memory_space<vmem>>, vector<2x8x32xf32>
    tpu.vector_store %arg2[%c0_10, %c0_11, %c0_12], %30 {strides = array<i32>} : memref<2x8x32xf32, #tpu.memory_space<vmem>>, vector<2x8x32xf32>,
    return
  }
}

</mosaic_0001>

<bundles_post_ra>
// kernel: multiplex_transformer_temporal_encoder.4
= control target key start
LH: loop header
LB: loop body
LE: loop exit
PB: predicated region body
PF: predicated region fallthrough
CT: control target
= control target key end

     0   :  { %vm21_vm0 = vcmask 261120   ;;  %s75_s0 = inlined_call_operand.vmem [shape: f32[2,16,32], index: 0, kind: input, shape index: {}]   ;;  %s76_s1 = inlined_call_operand.vmem [shape: f32[16,32], index: 1, kind: input, shape index: {}]   ;;  %s77_s2 = inlined_call_operand.vmem [shape: f32[2,16,32], index: 2, kind: output, shape index: {}]  }
   0x1   :  { %v11_v0 = vld [vmem:[%s75_s0] sm:$0xff]  ;;  %v12_v2 = vld [vmem:[%s75_s0 + $0x8] sm:$0xff]  ;;  %v13_v5 = vld [vmem:[%s75_s0 + $0x10] sm:$0xff] }
   0x2   :  { %v15_v1 = vld [vmem:[%s76_s1] sm:$0xff]  ;;  %v16_v4 = vld [vmem:[%s76_s1 + $0x8] sm:$0xff]  ;;  %v14_v6 = vld [vmem:[%s75_s0 + $0x18] sm:$0xff] }
   0x3   :  { %v17_v3 = vadd.f32 %v15_v1, %v11_v0  ;;  %v18_v7 = vadd.f32 %v16_v4, %v12_v2  ;;  %v19_v8 = vadd.f32 %v15_v1, %v13_v5  ;;  %v20_v9 = vadd.f32 %v16_v4, %v14_v6 }
   0x5   :  { %22 = vst.msk [vmem:[%s77_s2] sm:$0xff] %vm21_vm0, %v17_v3 }
   0x6   :  { %23 = vst.msk [vmem:[%s77_s2 + $0x8] sm:$0xff] %vm21_vm0, %v18_v7 }
   0x7   :  { %24 = vst.msk [vmem:[%s77_s2 + $0x10] sm:$0xff] %vm21_vm0, %v19_v8 }
   0x8   :  { %25 = vst.msk [vmem:[%s77_s2 + $0x18] sm:$0xff] %vm21_vm0, %v20_v9 }

// kernel: multiplex_transformer_temporal_encoder.7
= control target key start
LH: loop header
LB: loop body
LE: loop exit
PB: predicated region body
PF: predicated region fallthrough
CT: control target
= control target key end

     0   :  { %vm29_vm0 = vcmask 254976   ;;  %s1322_s0 = inlined_call_operand.vmem [shape: f32[2,8,2,32], index: 0, kind: input, shape index: {}]   ;;  %s1323_s1 = inlined_call_operand.vmem [shape: f32[2,32], index: 1, kind: input, shape index: {}]   ;;  %s1324_s2 = inlined_call_operand.hbm [shape: f32[2,8,32], index: 2, kind: output, shape index: {}]  }
   0x1   :  { %v713_v0 = vld [vmem:[%s1322_s0 + $0x10] sm:$0x3]  ;;  %v718_v1 = vld [vmem:[%s1322_s0 + $0x4] sm:$0x3]  ;;  %v727_v4 = vld [vmem:[%s1322_s0] sm:$0x3] }
   0x2   :  { %v54_v2 = vsel %vm29_vm0, %v713_v0, 0.0  ;;  %v36_v3 = vsel %vm29_vm0, %v718_v1, 0.0  ;;  %v30_v5 = vsel %vm29_vm0, %v727_v4, 0.0  ;;  %v734_v6 = vld [vmem:[%s1322_s0 + $0x12] sm:$0x3] }
   0x3   :  { %55 = vadd.xlane.f32.xlu1 %v54_v2  ;;  %37 = vadd.xlane.f32.xlu2 %v36_v3  ;;  %v739_v7 = vld [vmem:[%s1322_s0 + $0x14] sm:$0x3]  ;;  %v744_v8 = vld [vmem:[%s1322_s0 + $0x2] sm:$0x3] }
   0x4   :  { %31 = vadd.xlane.f32.xlu0 %v30_v5 }
   0x5   :  { %7 = vsyncpa [#allocation3], 0  ;;  %v57_v9 = vsel %vm29_vm0, %v734_v6, 0.0  ;;  %v60_v10 = vsel %vm29_vm0, %v739_v7, 0.0  ;;  %v33_v11 = vsel %vm29_vm0, %v744_v8, 0.0  ;;  %v101_v12 = vmul.f32 %v727_v4, %v727_v4  ;;  %s615_s17 = sshll.u32 %s1324_s2, 4  ;;  %s616_s17 = int_to_ptr.hbm [resolvable:$true] %s615_s17 }
   0x6   :  { %v757_v13 = vld [vmem:[%s1322_s0 + $0x16] sm:$0x3]  ;;  %v762_v14 = vld [vmem:[%s1322_s0 + $0x6] sm:$0x3]  ;;  %v109_v18 = vmul.f32 %v713_v0, %v713_v0  ;;  %v110_v19 = vmul.f32 %v734_v6, %v734_v6  ;;  %v102_v20 = vmul.f32 %v744_v8, %v744_v8  ;;  %v103_v24 = vmul.f32 %v718_v1, %v718_v1  ;;  %v783_v25 = vld [vmem:[%s1322_s0 + $0x18] sm:$0x3] }
   0x7   :  { %v63_v15 = vsel %vm29_vm0, %v757_v13, 0.0  ;;  %v117_v16 = vsel %vm29_vm0, %v101_v12, 0.0  ;;  %v39_v17 = vsel %vm29_vm0, %v762_v14, 0.0  ;;  %v788_v26 = vld [vmem:[%s1322_s0 + $0x8] sm:$0x3]  ;;  %v66_v27 = vsel %vm29_vm0, %v783_v25, 0.0 }
   0x8   :  { %v141_v21 = vsel %vm29_vm0, %v109_v18, 0.0  ;;  %v144_v22 = vsel %vm29_vm0, %v110_v19, 0.0  ;;  %v120_v23 = vsel %vm29_vm0, %v102_v20, 0.0  ;;  %v123_v28 = vsel %vm29_vm0, %v103_v24, 0.0  ;;  %v798_v30 = vld [vmem:[%s1322_s0 + $0xa] sm:$0x3] }
   0x9   :  { %v42_v29 = vsel %vm29_vm0, %v788_v26, 0.0  ;;  %v803_v31 = vld [vmem:[%s1322_s0 + $0x1a] sm:$0x3]  ;;  %v111_v32 = vmul.f32 %v739_v7, %v739_v7  ;;  %v45_v33 = vsel %vm29_vm0, %v798_v30, 0.0  ;;  %v112_v36 = vmul.f32 %v757_v13, %v757_v13  ;;  %v817_v37 = vld [vmem:[%s1322_s0 + $0xc] sm:$0x3] }
   0xa   :  { %v69_v34 = vsel %vm29_vm0, %v803_v31, 0.0  ;;  %v104_v38 = vmul.f32 %v762_v14, %v762_v14  ;;  %v48_v40 = vsel %vm29_vm0, %v817_v37, 0.0  ;;  %v105_v42 = vmul.f32 %v788_v26, %v788_v26  ;;  %v832_v44 = vld [vmem:[%s1322_s0 + $0x1c] sm:$0x3]  ;;  %v843_v49 = vld [vmem:[%s1322_s0 + $0x1e] sm:$0x3] }
   0xb   :  { %58 = vadd.xlane.f32.xlu1 %v57_v9  ;;  %61 = vadd.xlane.f32.xlu2 %v60_v10  ;;  %v147_v35 = vsel %vm29_vm0, %v111_v32, 0.0  ;;  %v150_v39 = vsel %vm29_vm0, %v112_v36, 0.0  ;;  %v113_v43 = vmul.f32 %v783_v25, %v783_v25  ;;  %v72_v47 = vsel %vm29_vm0, %v832_v44, 0.0  ;;  %v848_v50 = vld [vmem:[%s1322_s0 + $0xe] sm:$0x3]  ;;  %s693_s18 = smov 128  }
   0xc   :  { %34 = vadd.xlane.f32.xlu0 %v33_v11  ;;  %v126_v41 = vsel %vm29_vm0, %v104_v38, 0.0  ;;  %v129_v45 = vsel %vm29_vm0, %v105_v42, 0.0  ;;  %v106_v48 = vmul.f32 %v798_v30, %v798_v30  ;;  %v75_v51 = vsel %vm29_vm0, %v843_v49, 0.0  ;;  %s694_s19 = smov 8  }
   0xd   :  { %v153_v46 = vsel %vm29_vm0, %v113_v43, 0.0  ;;  %v51_v53 = vsel %vm29_vm0, %v848_v50, 0.0  ;;  %v107_v54 = vmul.f32 %v817_v37, %v817_v37  ;;  %v115_v55 = vmul.f32 %v832_v44, %v832_v44 }
   0xe   :  { %v132_v52 = vsel %vm29_vm0, %v106_v48, 0.0  ;;  %v114_v56 = vmul.f32 %v803_v31, %v803_v31  ;;  %v116_v60 = vmul.f32 %v843_v49, %v843_v49  ;;  %v108_v61 = vmul.f32 %v848_v50, %v848_v50 }
   0xf   :  { %v135_v57 = vsel %vm29_vm0, %v107_v54, 0.0  ;;  %v159_v58 = vsel %vm29_vm0, %v115_v55, 0.0  ;;  %v691_v2 = vmov 32.0  }
  0x10   :  { %v156_v59 = vsel %vm29_vm0, %v114_v56, 0.0  ;;  %v162_v62 = vsel %vm29_vm0, %v116_v60, 0.0  ;;  %v138_v63 = vsel %vm29_vm0, %v108_v61, 0.0  ;;  %631 = vrcp.f32 %v691_v2 }
  0x13   :  { %64 = vadd.xlane.f32.xlu1 %v63_v15  ;;  %118 = vadd.xlane.f32.xlu2 %v117_v16 }
  0x14   :  { %40 = vadd.xlane.f32.xlu0 %v39_v17 }
  0x16   :  { %v632_v3 = vpop.eup %631 }
  0x17   :  { %v79_v5 = vmul.f32 32.0, %v632_v3  ;;  %vm83_vm1 = vweird.f32 %v632_v3 }
  0x19   :  { %v80_v9 = vsub.f32 1.0, %v79_v5 }
  0x1b   :  { %142 = vadd.xlane.f32.xlu1 %v141_v21  ;;  %145 = vadd.xlane.f32.xlu2 %v144_v22  ;;  %v81_v15 = vmul.f32 %v632_v3, %v80_v9 }
  0x1c   :  { %121 = vadd.xlane.f32.xlu0 %v120_v23 }
  0x1d   :  { %v82_v16 = vadd.f32 %v632_v3, %v81_v15 }
  0x1f   :  { %v870_v20 = vsel %vm83_vm1, %v632_v3, %v82_v16 }
  0x23   :  { %67 = vadd.xlane.f32.xlu1 %v66_v27  ;;  %124 = vadd.xlane.f32.xlu2 %v123_v28 }
  0x24   :  { %43 = vadd.xlane.f32.xlu0 %v42_v29 }
  0x2b   :  { %46 = vadd.xlane.f32.xlu1 %v45_v33  ;;  %70 = vadd.xlane.f32.xlu2 %v69_v34 }
  0x2c   :  { %148 = vadd.xlane.f32.xlu0 %v147_v35 }
  0x33   :  { %151 = vadd.xlane.f32.xlu1 %v150_v39  ;;  %49 = vadd.xlane.f32.xlu2 %v48_v40 }
  0x34   :  { %127 = vadd.xlane.f32.xlu0 %v126_v41 }
  0x3b   :  { %130 = vadd.xlane.f32.xlu1 %v129_v45  ;;  %154 = vadd.xlane.f32.xlu2 %v153_v46 }
  0x3c   :  { %73 = vadd.xlane.f32.xlu0 %v72_v47 }
  0x43   :  { %76 = vadd.xlane.f32.xlu1 %v75_v51  ;;  %133 = vadd.xlane.f32.xlu2 %v132_v52 }
  0x44   :  { %52 = vadd.xlane.f32.xlu0 %v51_v53 }
  0x4b   :  { %136 = vadd.xlane.f32.xlu1 %v135_v57  ;;  %160 = vadd.xlane.f32.xlu2 %v159_v58 }
  0x4c   :  { %157 = vadd.xlane.f32.xlu0 %v156_v59 }
  0x53   :  { %163 = vadd.xlane.f32.xlu1 %v162_v62 }
  0x54   :  { %139 = vadd.xlane.f32.xlu0 %v138_v63 }
  0x76   :  { %v56_v10 = vpop.xlane.xlu1 %55  ;;  %v38_v11 = vpop.xlane.xlu2 %37 }
  0x77   :  { %v32_v12 = vpop.xlane.xlu0 %31  ;;  %v883_v32 = vmul.f32 %v870_v20, %v56_v10  ;;  %v901_v53 = vmul.f32 %v870_v20, %v38_v11 }
  0x78   :  { %v873_v21 = vmul.f32 %v870_v20, %v32_v12  ;;  %v28_v12 = vld [vmem:[%s1323_s1] sm:$0x3]  ;;  %s692_s1 = smov [#allocation2]  }
  0x79   :  { %v189_v39 = vmul.f32 %v883_v32, %v883_v32  ;;  %v183_v61 = vmul.f32 %v901_v53, %v901_v53  ;;  %s613_s14 = sshll.u32 %s692_s1, 4  ;;  %s614_s14 = int_to_ptr.vmem [resolvable:$true] %s613_s14 }
  0x7a   :  { %v181_v24 = vmul.f32 %v873_v21, %v873_v21 }
  0x7e   :  { %v59_v17 = vpop.xlane.xlu1 %58  ;;  %v62_v18 = vpop.xlane.xlu2 %61 }
  0x7f   :  { %v35_v19 = vpop.xlane.xlu0 %34  ;;  %v886_v33 = vmul.f32 %v870_v20, %v59_v17 }
  0x80   :  { %v889_v35 = vmul.f32 %v870_v20, %v35_v19  ;;  %v924_v19 = vmul.f32 %v870_v20, %v62_v18  ;;  %v213_v18 = vsub.f32 %v727_v4, %v873_v21 }
  0x81   :  { %v190_v40 = vmul.f32 %v886_v33, %v886_v33 }
  0x82   :  { %v182_v45 = vmul.f32 %v889_v35, %v889_v35  ;;  %v191_v4 = vmul.f32 %v924_v19, %v924_v19 }
  0x86   :  { %v875_v22 = vpop.xlane.xlu1 %64  ;;  %v119_v23 = vpop.xlane.xlu2 %118 }
  0x87   :  { %v165_v27 = vmul.f32 %v119_v23, %v870_v20  ;;  %v880_v28 = vpop.xlane.xlu0 %40 }
  0x89   :  { %v197_v29 = vsub.f32 %v165_v27, %v181_v24 }
  0x8b   :  { %v229_v34 = vadd.f32 1e-05, %v197_v29 }
  0x8d   :  { %633 = vrsqrt.f32 %v229_v34  ;;  %vm251_vm3 = vweird.f32 %v229_v34 }
  0x8e   :  { %v143_v36 = vpop.xlane.xlu1 %142  ;;  %v146_v38 = vpop.xlane.xlu2 %145 }
  0x8f   :  { %v173_v41 = vmul.f32 %v143_v36, %v870_v20  ;;  %v174_v42 = vmul.f32 %v146_v38, %v870_v20  ;;  %v122_v43 = vpop.xlane.xlu0 %121 }
  0x90   :  { %v166_v46 = vmul.f32 %v122_v43, %v870_v20  ;;  %v221_v43 = vsub.f32 %v713_v0, %v883_v32 }
  0x91   :  { %v205_v47 = vsub.f32 %v173_v41, %v189_v39  ;;  %v206_v48 = vsub.f32 %v174_v42, %v190_v40  ;;  %v942_v39 = vperm.slane %v28_v12, 0  ;;  %v944_v40 = vperm.slane %v28_v12, 1 }
  0x92   :  { %v198_v51 = vsub.f32 %v166_v46, %v182_v45 }
  0x93   :  { %v634_v52 = vpop.eup %633  ;;  %v237_v54 = vadd.f32 1e-05, %v205_v47  ;;  %v903_v55 = vadd.f32 1e-05, %v206_v48  ;;  %v222_v48 = vsub.f32 %v734_v6, %v886_v33 }
  0x94   :  { %v246_v56 = vmul.f32 %v634_v52, %v229_v34  ;;  %v905_v57 = vadd.f32 1e-05, %v198_v51  ;;  %vm252_vm2 = vweird.f32 %v634_v52 }
  0x95   :  { %635 = vrsqrt.f32 %v237_v54  ;;  %vm926_vm4 = vmor %vm251_vm3, %vm252_vm2  ;;  %vm331_vm6 = vweird.f32 %v237_v54  ;;  %vm341_vm10 = vweird.f32 %v903_v55 }
  0x96   :  { %v247_v58 = vmul.f32 %v634_v52, %v246_v56  ;;  %637 = vrsqrt.f32 %v903_v55  ;;  %v908_v59 = vpop.xlane.xlu1 %67  ;;  %v125_v60 = vpop.xlane.xlu2 %124  ;;  %vm261_vm12 = vweird.f32 %v905_v57 }
  0x97   :  { %639 = vrsqrt.f32 %v905_v57  ;;  %v167_v62 = vmul.f32 %v125_v60, %v870_v20  ;;  %v914_v63 = vpop.xlane.xlu0 %43 }
  0x98   :  { %v248_v2 = vmul.f32 0.5, %v247_v58 }
  0x99   :  { %v199_v3 = vsub.f32 %v167_v62, %v183_v61 }
  0x9a   :  { %v249_v5 = vsub.f32 1.5, %v248_v2 }
  0x9b   :  { %v636_v9 = vpop.eup %635  ;;  %v916_v10 = vadd.f32 1e-05, %v199_v3 }
  0x9c   :  { %v638_v11 = vpop.eup %637  ;;  %v250_v15 = vmul.f32 %v634_v52, %v249_v5  ;;  %v326_v16 = vmul.f32 %v636_v9, %v237_v54  ;;  %vm332_vm5 = vweird.f32 %v636_v9 }
  0x9d   :  { %v921_v17 = vpop.eup %639  ;;  %v336_v24 = vmul.f32 %v638_v11, %v903_v55  ;;  %641 = vrsqrt.f32 %v916_v10  ;;  %vm342_vm7 = vweird.f32 %v638_v11  ;;  %vm333_vm9 = vmor %vm331_vm6, %vm332_vm5  ;;  %vm271_vm15 = vweird.f32 %v916_v10 }
  0x9e   :  { %v254_v27 = vsel %vm926_vm4, %v634_v52, %v250_v15  ;;  %v327_v29 = vmul.f32 %v636_v9, %v326_v16  ;;  %v256_v34 = vmul.f32 %v921_v17, %v905_v57  ;;  %v936_v36 = vpop.xlane.xlu1 %46  ;;  %v938_v38 = vpop.xlane.xlu2 %70  ;;  %v956_v52 = vmul.f32 %v870_v20, %v875_v22  ;;  %vm343_vm11 = vmor %vm341_vm10, %vm342_vm7 }
  0x9f   :  { %v337_v41 = vmul.f32 %v638_v11, %v336_v24  ;;  %v149_v42 = vpop.xlane.xlu0 %148  ;;  %v405_v21 = vmul.f32 %v254_v27, %v213_v18  ;;  %vm262_vm8 = vweird.f32 %v921_v17  ;;  %v214_v15 = vsub.f32 %v744_v8, %v889_v35 }
  0xa0   :  { %v328_v45 = vmul.f32 0.5, %v327_v29  ;;  %v257_v46 = vmul.f32 %v921_v17, %v256_v34  ;;  %v175_v47 = vmul.f32 %v149_v42, %v870_v20  ;;  %vm263_vm13 = vmor %vm261_vm12, %vm262_vm8  ;;  %v979_v24 = vmul.f32 %v870_v20, %v880_v28 }
  0xa1   :  { %v338_v51 = vmul.f32 0.5, %v337_v41  ;;  %v422_v62 = vmul.f32 %v942_v39, %v405_v21  ;;  %v192_v8 = vmul.f32 %v956_v52, %v956_v52 }
  0xa2   :  { %v329_v56 = vsub.f32 1.5, %v328_v45  ;;  %v258_v0 = vmul.f32 0.5, %v257_v46  ;;  %v207_v60 = vsub.f32 %v175_v47, %v191_v4 }
  0xa3   :  { %v958_v32 = vpop.eup %641  ;;  %v339_v58 = vsub.f32 1.5, %v338_v51  ;;  %v439_v35 = vadd.f32 %v944_v40, %v422_v62  ;;  %v1003_v51 = vmul.f32 %v870_v20, %v914_v63 }
  0xa4   :  { %v330_v61 = vmul.f32 %v636_v9, %v329_v56  ;;  %v259_v6 = vsub.f32 1.5, %v258_v0  ;;  %v266_v33 = vmul.f32 %v958_v32, %v916_v10  ;;  %v965_v2 = vadd.f32 1e-05, %v207_v60 }
  0xa5   :  { %v340_v22 = vmul.f32 %v638_v11, %v339_v58  ;;  %vm272_vm14 = vweird.f32 %v958_v32  ;;  %v455_v47 = vsel %vm29_vm0, %v439_v35, 0.0 }
  0xa6   :  { %v334_v3 = vsel %vm333_vm9, %v636_v9, %v330_v61  ;;  %v260_v54 = vmul.f32 %v921_v17, %v259_v6  ;;  %v267_v5 = vmul.f32 %v958_v32, %v266_v33  ;;  %v152_v12 = vpop.xlane.xlu1 %151  ;;  %643 = vrsqrt.f32 %v965_v2  ;;  %v975_v55 = vpop.xlane.xlu2 %49  ;;  %vm273_vm1 = vmor %vm271_vm15, %vm272_vm14 }
  0xa7   :  { %v413_v16 = vmul.f32 %v334_v3, %v221_v43  ;;  %v344_v23 = vsel %vm343_vm11, %v638_v11, %v340_v22  ;;  %v128_v9 = vpop.xlane.xlu0 %127  ;;  %v176_v34 = vmul.f32 %v152_v12, %v870_v20  ;;  %v456_v61 = vrot.slane %v455_v47, 4 }
  0xa8   :  { %v414_v57 = vmul.f32 %v344_v23, %v222_v48  ;;  %v264_v27 = vsel %vm263_vm13, %v921_v17, %v260_v54  ;;  %v268_v29 = vmul.f32 0.5, %v267_v5  ;;  %v168_v42 = vmul.f32 %v128_v9, %v870_v20 }
  0xa9   :  { %v430_v11 = vmul.f32 %v942_v39, %v413_v16  ;;  %v406_v18 = vmul.f32 %v264_v27, %v214_v15  ;;  %v208_v43 = vsub.f32 %v176_v34, %v192_v8  ;;  %v184_v17 = vmul.f32 %v979_v24, %v979_v24 }
  0xaa   :  { %v269_v41 = vsub.f32 1.5, %v268_v29  ;;  %v431_v28 = vmul.f32 %v942_v39, %v414_v57  ;;  %v215_v33 = vsub.f32 %v718_v1, %v901_v53  ;;  %v1017_v3 = vmul.f32 %v870_v20, %v908_v59 }
  0xab   :  { %v447_v48 = vadd.f32 %v944_v40, %v430_v11  ;;  %v997_v4 = vadd.f32 1e-05, %v208_v43  ;;  %v423_v21 = vmul.f32 %v942_v39, %v406_v18  ;;  %v200_v56 = vsub.f32 %v168_v42, %v184_v17 }
  0xac   :  { %v270_v45 = vmul.f32 %v958_v32, %v269_v41  ;;  %v993_v46 = vpop.eup %643  ;;  %v448_v58 = vadd.f32 %v944_v40, %v431_v28  ;;  %v185_v54 = vmul.f32 %v1003_v51, %v1003_v51  ;;  %v457_v16 = vadd.f32 %v456_v61, %v455_v47 }
  0xad   :  { %v346_v60 = vmul.f32 %v993_v46, %v965_v2  ;;  %v511_v10 = vsel %vm29_vm0, %v447_v48, 0.0  ;;  %645 = vrsqrt.f32 %v997_v4  ;;  %v440_v22 = vadd.f32 %v944_v40, %v423_v21 }
  0xae   :  { %v131_v0 = vpop.xlane.xlu1 %130  ;;  %v274_v6 = vsel %vm273_vm1, %v958_v32, %v270_v45  ;;  %v155_v63 = vpop.xlane.xlu2 %154  ;;  %v1021_v32 = vadd.f32 1e-05, %v200_v56  ;;  %v518_v1 = vsel %vm29_vm0, %v448_v58, 0.0  ;;  %v512_v23 = vrot.slane %v511_v10, 4 }
  0xaf   :  { %v347_v62 = vmul.f32 %v993_v46, %v346_v60  ;;  %v1023_v5 = vpop.xlane.xlu0 %73  ;;  %v407_v53 = vmul.f32 %v274_v6, %v215_v33  ;;  %v169_v15 = vmul.f32 %v131_v0, %v870_v20  ;;  %v223_v59 = vsub.f32 %v739_v7, %v924_v19 }
  0xb0   :  { %647 = vrsqrt.f32 %v1021_v32  ;;  %v224_v9 = vsub.f32 %v757_v13, %v956_v52  ;;  %v216_v27 = vsub.f32 %v762_v14, %v979_v24  ;;  %v519_v29 = vrot.slane %v518_v1, 4 }
  0xb1   :  { %v348_v12 = vmul.f32 0.5, %v347_v62  ;;  %v201_v57 = vsub.f32 %v169_v15, %v185_v54  ;;  %v462_v8 = vsel %vm29_vm0, %v440_v22, 0.0  ;;  %v193_v18 = vmul.f32 %v1017_v3, %v1017_v3 }
  0xb2   :  { %v424_v7 = vmul.f32 %v942_v39, %v407_v53  ;;  %v177_v41 = vmul.f32 %v155_v63, %v870_v20  ;;  %v458_v42 = vrot.slane %v457_v16, 2  ;;  %v513_v28 = vadd.f32 %v512_v23, %v511_v10 }
  0xb3   :  { %v349_v35 = vsub.f32 1.5, %v348_v12  ;;  %v1037_v34 = vpop.eup %645  ;;  %v1042_v19 = vadd.f32 1e-05, %v201_v57  ;;  %v225_v43 = vsub.f32 %v783_v25, %v1017_v3  ;;  %v463_v45 = vrot.slane %v462_v8, 4 }
  0xb4   :  { %v356_v17 = vmul.f32 %v1037_v34, %v997_v4  ;;  %v217_v47 = vsub.f32 %v788_v26, %v1003_v51  ;;  %v1053_v48 = vmul.f32 %v870_v20, %v936_v36  ;;  %v520_v56 = vadd.f32 %v519_v29, %v518_v1 }
  0xb5   :  { %649 = vrsqrt.f32 %v1042_v19  ;;  %v350_v0 = vmul.f32 %v993_v46, %v349_v35  ;;  %vm352_vm2 = vweird.f32 %v993_v46  ;;  %v441_v60 = vadd.f32 %v944_v40, %v424_v7 }
  0xb6   :  { %v1035_v11 = vpop.xlane.xlu1 %76  ;;  %v1056_v21 = vpop.eup %647  ;;  %v357_v58 = vmul.f32 %v1037_v34, %v356_v17  ;;  %v1064_v61 = vmul.f32 %v870_v20, %v938_v38  ;;  %v209_v6 = vsub.f32 %v177_v41, %v193_v18  ;;  %v459_v10 = vadd.f32 %v458_v42, %v457_v16 }
  0xb7   :  { %v276_v36 = vmul.f32 %v1056_v21, %v1021_v32  ;;  %v134_v33 = vpop.xlane.xlu2 %133  ;;  %v514_v62 = vrot.slane %v513_v28, 2  ;;  %vm351_vm3 = vweird.f32 %v965_v2  ;;  %v1069_v22 = vpop.xlane.xlu0 %52  ;;  %v464_v54 = vadd.f32 %v463_v45, %v462_v8 }
  0xb8   :  { %v358_v63 = vmul.f32 0.5, %v357_v58  ;;  %v186_v1 = vmul.f32 %v1053_v48, %v1053_v48  ;;  %vm1073_vm4 = vmor %vm351_vm3, %vm352_vm2  ;;  %v1079_v38 = vmul.f32 %v870_v20, %v975_v55  ;;  %v1081_v12 = vadd.f32 1e-05, %v209_v6 }
  0xb9   :  { %v521_v15 = vrot.slane %v520_v56, 2  ;;  %v218_v2 = vsub.f32 %v798_v30, %v1053_v48  ;;  %v354_v16 = vsel %vm1073_vm4, %v993_v46, %v350_v0  ;;  %v170_v23 = vmul.f32 %v134_v33, %v870_v20 }
  0xba   :  { %v469_v29 = vsel %vm29_vm0, %v441_v60, 0.0  ;;  %v359_v8 = vsub.f32 1.5, %v358_v63  ;;  %v277_v55 = vmul.f32 %v1056_v21, %v276_v36  ;;  %651 = vrsqrt.f32 %v1081_v12 }
  0xbb   :  { %v1089_v57 = vpop.eup %649  ;;  %v460_v35 = vrot.slane %v459_v10, 1  ;;  %v515_v18 = vadd.f32 %v514_v62, %v513_v28  ;;  %v1096_v7 = vmul.f32 %v1064_v61, %v1064_v61  ;;  %v465_v42 = vrot.slane %v464_v54, 2 }
  0xbc   :  { %v286_v46 = vmul.f32 %v1089_v57, %v1042_v19  ;;  %v415_v45 = vmul.f32 %v354_v16, %v223_v59  ;;  %v187_v0 = vmul.f32 %v1079_v38, %v1079_v38  ;;  %v1104_v58 = vadd.f32 %v521_v15, %v520_v56 }
  0xbd   :  { %v470_v60 = vrot.slane %v469_v29, 4  ;;  %v219_v28 = vsub.f32 %v817_v37, %v1079_v38  ;;  %v202_v36 = vsub.f32 %v170_v23, %v186_v1  ;;  %v360_v6 = vmul.f32 %v1037_v34, %v359_v8 }
  0xbe   :  { %v137_v41 = vpop.xlane.xlu1 %136  ;;  %vm362_vm5 = vweird.f32 %v1037_v34  ;;  %v278_v33 = vmul.f32 0.5, %v277_v55  ;;  %v1111_v63 = vadd.f32 %v460_v35, %v459_v10  ;;  %v516_v59 = vrot.slane %v515_v18, 1 }
  0xbf   :  { %v171_v62 = vmul.f32 %v137_v41, %v870_v20  ;;  %v287_v53 = vmul.f32 %v1089_v57, %v286_v46  ;;  %v1114_v16 = vadd.f32 1e-05, %v202_v36  ;;  %v1116_v15 = vadd.f32 %v465_v42, %v464_v54  ;;  %v161_v54 = vpop.xlane.xlu2 %160  ;;  %v158_v35 = vpop.xlane.xlu0 %157 }
  0xc0   :  { %v652_v56 = vpop.eup %651  ;;  %v432_v17 = vmul.f32 %v942_v39, %v415_v45  ;;  %vm361_vm6 = vweird.f32 %v997_v4  ;;  %v471_v23 = vadd.f32 %v470_v60, %v469_v29  ;;  %vm281_vm8 = vweird.f32 %v1021_v32 }
  0xc1   :  { %v203_v1 = vsub.f32 %v171_v62, %v187_v0  ;;  %vm1120_vm7 = vmor %vm361_vm6, %vm362_vm5  ;;  %v366_v10 = vmul.f32 %v652_v56, %v1081_v12  ;;  %v1128_v55 = vmul.f32 %v870_v20, %v1023_v5  ;;  %v279_v29 = vsub.f32 1.5, %v278_v33 }
  0xc2   :  { %v364_v4 = vsel %vm1120_vm7, %v1037_v34, %v360_v6  ;;  %653 = vrsqrt.f32 %v1114_v16  ;;  %v1135_v41 = vadd.f32 %v516_v59, %v515_v18  ;;  %v288_v42 = vmul.f32 0.5, %v287_v53 }
  0xc3   :  { %v367_v45 = vmul.f32 %v652_v56, %v366_v10  ;;  %v1137_v0 = vadd.f32 1e-05, %v203_v1  ;;  %v467_v5 = vrot.slane %v1116_v15, 1  ;;  %v449_v60 = vadd.f32 %v944_v40, %v432_v17 }
  0xc4   :  { %v179_v36 = vmul.f32 %v161_v54, %v870_v20  ;;  %v178_v62 = vmul.f32 %v158_v35, %v870_v20  ;;  %v472_v46 = vrot.slane %v471_v23, 2  ;;  %v416_v34 = vmul.f32 %v364_v4, %v224_v9 }
  0xc5   :  { %v368_v6 = vmul.f32 0.5, %v367_v45  ;;  %v195_v18 = vmul.f32 %v1128_v55, %v1128_v55  ;;  %v280_v33 = vmul.f32 %v1056_v21, %v279_v29  ;;  %vm282_vm9 = vweird.f32 %v1056_v21 }
  0xc6   :  { %v1152_v17 = vmul.f32 %v870_v20, %v1035_v11  ;;  %655 = vrsqrt.f32 %v1137_v0  ;;  %v164_v59 = vpop.xlane.xlu1 %163  ;;  %v289_v53 = vsub.f32 1.5, %v288_v42  ;;  %vm372_vm10 = vweird.f32 %v652_v56  ;;  %vm1164_vm13 = vmor %vm281_vm8, %vm282_vm9 }
  0xc7   :  { %v369_v1 = vsub.f32 1.5, %v368_v6  ;;  %v211_v13 = vsub.f32 %v179_v36, %v195_v18  ;;  %v525_v9 = vsel %vm29_vm0, %v449_v60, 0.0  ;;  %vm291_vm11 = vweird.f32 %v1042_v19  ;;  %v140_v24 = vpop.xlane.xlu0 %139 }
  0xc8   :  { %v1155_v52 = vpop.eup %653  ;;  %vm371_vm12 = vweird.f32 %v1081_v12  ;;  %v210_v8 = vsub.f32 %v178_v62, %v1096_v7  ;;  %v433_v11 = vmul.f32 %v942_v39, %v416_v34  ;;  %v180_v4 = vmul.f32 %v164_v59, %v870_v20 }
  0xc9   :  { %v370_v54 = vmul.f32 %v652_v56, %v369_v1  ;;  %v296_v35 = vmul.f32 %v1155_v52, %v1114_v16  ;;  %v473_v29 = vadd.f32 %v472_v46, %v471_v23  ;;  %vm292_vm14 = vweird.f32 %v1089_v57  ;;  %vm373_vm15 = vmor %vm371_vm12, %vm372_vm10 }
  0xca   :  { %v196_v12 = vmul.f32 %v1152_v17, %v1152_v17  ;;  %v1174_v7 = vadd.f32 1e-05, %v211_v13  ;;  %v284_v32 = vsel %vm1164_vm13, %v1056_v21, %v280_v33  ;;  %v290_v42 = vmul.f32 %v1089_v57, %v289_v53  ;;  %vm1197_vm1 = vmor %vm291_vm11, %vm292_vm14 }
  0xcb   :  { %v374_v45 = vsel %vm373_vm15, %v652_v56, %v370_v54  ;;  %v297_v60 = vmul.f32 %v1155_v52, %v296_v35  ;;  %v526_v62 = vrot.slane %v525_v9, 4  ;;  %v1185_v46 = vadd.f32 1e-05, %v210_v8 }
  0xcc   :  { %v656_v36 = vpop.eup %655  ;;  %v417_v23 = vmul.f32 %v374_v45, %v225_v43  ;;  %657 = vrsqrt.f32 %v1174_v7  ;;  %v450_v34 = vadd.f32 %v944_v40, %v433_v11  ;;  %v212_v18 = vsub.f32 %v180_v4, %v196_v12 }
  0xcd   :  { %v298_v6 = vmul.f32 0.5, %v297_v60  ;;  %v306_v21 = vmul.f32 %v656_v36, %v1137_v0  ;;  %v468_v56 = vadd.f32 %v467_v5, %v1116_v15  ;;  %v474_v33 = vrot.slane %v473_v29, 1 }
  0xce   :  { %v408_v59 = vmul.f32 %v284_v32, %v216_v27  ;;  %v1203_v3 = vmul.f32 %v870_v20, %v1069_v22  ;;  %v294_v43 = vsel %vm1197_vm1, %v1089_v57, %v290_v42  ;;  %vm302_vm2 = vweird.f32 %v1155_v52 }
  0xcf   :  { %v299_v15 = vsub.f32 1.5, %v298_v6  ;;  %v307_v14 = vmul.f32 %v656_v36, %v306_v21  ;;  %v1209_v27 = vadd.f32 %v526_v62, %v525_v9  ;;  %v434_v19 = vmul.f32 %v942_v39, %v417_v23 }
  0xd0   :  { %vm301_vm3 = vweird.f32 %v1114_v16  ;;  %659 = vrsqrt.f32 %v1185_v46  ;;  %v532_v22 = vsel %vm29_vm0, %v450_v34, 0.0  ;;  %v1216_v1 = vadd.f32 1e-05, %v212_v18 }
  0xd1   :  { %v300_v5 = vmul.f32 %v1155_v52, %v299_v15  ;;  %v308_v53 = vmul.f32 0.5, %v307_v14  ;;  %v425_v13 = vmul.f32 %v942_v39, %v408_v59  ;;  %v409_v9 = vmul.f32 %v294_v43, %v217_v47  ;;  %vm1222_vm4 = vmor %vm301_vm3, %vm302_vm2 }
  0xd2   :  { %v658_v57 = vpop.eup %657  ;;  %v188_v16 = vmul.f32 %v1203_v3, %v1203_v3  ;;  %v172_v11 = vmul.f32 %v140_v24, %v870_v20  ;;  %vm312_vm5 = vweird.f32 %v656_v36  ;;  %vm583_vm6 = vcmask 1041409  }
  0xd3   :  { %v304_v10 = vsel %vm1222_vm4, %v1155_v52, %v300_v5  ;;  %v309_v54 = vsub.f32 1.5, %v308_v53  ;;  %v533_v35 = vrot.slane %v532_v22, 4  ;;  %v451_v26 = vadd.f32 %v944_v40, %v434_v19 }
  0xd4   :  { %v386_v51 = vmul.f32 %v658_v57, %v1174_v7  ;;  %661 = vrsqrt.f32 %v1216_v1  ;;  %v475_v47 = vadd.f32 %v474_v33, %v473_v29  ;;  %v227_v4 = vsub.f32 %v832_v44, %v1128_v55 }
  0xd5   :  { %v310_v12 = vmul.f32 %v656_v36, %v309_v54  ;;  %vm311_vm7 = vweird.f32 %v1137_v0  ;;  %v410_v52 = vmul.f32 %v304_v10, %v218_v2  ;;  %v204_v42 = vsub.f32 %v172_v11, %v188_v16 }
  0xd6   :  { %v660_v20 = vpop.eup %659  ;;  %vm313_vm8 = vmor %vm311_vm7, %vm312_vm5  ;;  %v387_v32 = vmul.f32 %v658_v57, %v386_v51  ;;  %v584_v45 = vsel %vm583_vm6, %v468_v56, %v1111_v63  ;;  %v442_v60 = vadd.f32 %v944_v40, %v425_v13  ;;  %v426_v29 = vmul.f32 %v942_v39, %v409_v9 }
  0xd7   :  { %v314_v62 = vsel %vm313_vm8, %v656_v36, %v310_v12  ;;  %v376_v44 = vmul.f32 %v660_v20, %v1185_v46  ;;  %v528_v55 = vrot.slane %v1209_v27, 2  ;;  %v1247_v0 = vadd.f32 %v533_v35, %v532_v22 }
  0xd8   :  { %v539_v30 = vsel %vm29_vm0, %v451_v26, 0.0  ;;  %v388_v48 = vmul.f32 0.5, %v387_v32  ;;  %v411_v2 = vmul.f32 %v314_v62, %v219_v28  ;;  %v1253_v63 = vadd.f32 1e-05, %v204_v42 }
  0xd9   :  { %v377_v23 = vmul.f32 %v660_v20, %v376_v44  ;;  %vm585_vm9 = vcmask 1042434   ;;  %v427_v36 = vmul.f32 %v942_v39, %v410_v52  ;;  %vm392_vm10 = vweird.f32 %v658_v57 }
  0xda   :  { %v662_v34 = vpop.eup %661  ;;  %v389_v6 = vsub.f32 1.5, %v388_v48  ;;  %v1257_v21 = vsel %vm585_vm9, %v475_v47, %v584_v45  ;;  %v476_v18 = vsel %vm29_vm0, %v442_v60, 0.0  ;;  %v443_v56 = vadd.f32 %v944_v40, %v426_v29 }
  0xdb   :  { %v378_v33 = vmul.f32 0.5, %v377_v23  ;;  %v396_v37 = vmul.f32 %v662_v34, %v1216_v1  ;;  %v540_v38 = vrot.slane %v539_v30, 4  ;;  %vm391_vm11 = vweird.f32 %v1174_v7 }
  0xdc   :  { %v390_v28 = vmul.f32 %v658_v57, %v389_v6  ;;  %663 = vrsqrt.f32 %v1253_v63  ;;  %v428_v59 = vmul.f32 %v942_v39, %v411_v2  ;;  %vm393_vm12 = vmor %vm391_vm11, %vm392_vm10  ;;  %vm382_vm13 = vweird.f32 %v660_v20 }
  0xdd   :  { %v379_v25 = vsub.f32 1.5, %v378_v33  ;;  %v397_v43 = vmul.f32 %v662_v34, %v396_v37  ;;  %v1337_v15 = vrot.slane %v1104_v58, 1  ;;  %v228_v24 = vsub.f32 %v843_v49, %v1152_v17 }
  0xde   :  { %v444_v19 = vadd.f32 %v944_v40, %v427_v36  ;;  %v394_v22 = vsel %vm393_vm12, %v658_v57, %v390_v28  ;;  %v477_v5 = vrot.slane %v476_v18, 4  ;;  %vm381_vm14 = vweird.f32 %v1185_v46 }
  0xdf   :  { %v524_v14 = vadd.f32 %v1337_v15, %v1104_v58  ;;  %v419_v7 = vmul.f32 %v394_v22, %v227_v4  ;;  %v380_v53 = vmul.f32 %v660_v20, %v379_v25  ;;  %v1273_v13 = vadd.f32 %v528_v55, %v1209_v27  ;;  %vm383_vm15 = vmor %vm381_vm14, %vm382_vm13 }
  0xe0   :  { %v483_v9 = vsel %vm29_vm0, %v443_v56, 0.0  ;;  %v541_v8 = vadd.f32 %v540_v38, %v539_v30  ;;  %v398_v16 = vmul.f32 0.5, %v397_v43  ;;  %v535_v58 = vrot.slane %v1247_v0, 2 }
  0xe1   :  { %v445_v49 = vadd.f32 %v944_v40, %v428_v59  ;;  %v436_v17 = vmul.f32 %v942_v39, %v419_v7  ;;  %v384_v57 = vsel %vm383_vm15, %v660_v20, %v380_v53  ;;  %v490_v10 = vsel %vm29_vm0, %v444_v19, 0.0 }
  0xe2   :  { %v664_v11 = vpop.eup %663  ;;  %v1338_v46 = vsub.f32 %v803_v31, %v1064_v61  ;;  %v399_v54 = vsub.f32 1.5, %v398_v16  ;;  %vm402_vm1 = vweird.f32 %v662_v34  ;;  %v478_v35 = vadd.f32 %v477_v5, %v476_v18 }
  0xe3   :  { %v484_v26 = vrot.slane %v483_v9, 4  ;;  %v453_v51 = vadd.f32 %v944_v40, %v436_v17  ;;  %v316_v47 = vmul.f32 %v664_v11, %v1253_v63  ;;  %v542_v4 = vrot.slane %v541_v8, 2 }
  0xe4   :  { %v418_v27 = vmul.f32 %v384_v57, %v1338_v46  ;;  %v400_v52 = vmul.f32 %v662_v34, %v399_v54  ;;  %vm401_vm2 = vweird.f32 %v1216_v1  ;;  %v491_v20 = vrot.slane %v490_v10, 4 }
  0xe5   :  { %v497_v32 = vsel %vm29_vm0, %v445_v49, 0.0  ;;  %v553_v31 = vsel %vm29_vm0, %v453_v51, 0.0  ;;  %vm403_vm3 = vmor %vm401_vm2, %vm402_vm1  ;;  %v317_v61 = vmul.f32 %v664_v11, %v316_v47  ;;  %v597_v29 = vsel %vm583_vm6, %v524_v14, %v1135_v41 }
  0xe6   :  { %v435_v12 = vmul.f32 %v942_v39, %v418_v27  ;;  %v554_v42 = vrot.slane %v553_v31, 4  ;;  %v404_v60 = vsel %vm403_vm3, %v662_v34, %v400_v52  ;;  %v530_v62 = vrot.slane %v1273_v13, 1 }
  0xe7   :  { %v536_v44 = vadd.f32 %v535_v58, %v1247_v0  ;;  %v420_v55 = vmul.f32 %v404_v60, %v228_v24  ;;  %v318_v1 = vmul.f32 0.5, %v317_v61  ;;  %v543_v30 = vadd.f32 %v542_v4, %v541_v8 }
  0xe8   :  { %v452_v45 = vadd.f32 %v944_v40, %v435_v12  ;;  %v498_v48 = vrot.slane %v497_v32, 4  ;;  %v555_v2 = vadd.f32 %v554_v42, %v553_v31  ;;  %vm322_vm4 = vweird.f32 %v664_v11 }
  0xe9   :  { %v437_v6 = vmul.f32 %v942_v39, %v420_v55  ;;  %v319_v18 = vsub.f32 1.5, %v318_v1  ;;  %v479_v34 = vrot.slane %v478_v35, 2  ;;  %v485_v56 = vadd.f32 %v484_v26, %v483_v9 }
  0xea   :  { %v546_v23 = vsel %vm29_vm0, %v452_v45, 0.0  ;;  %v492_v33 = vadd.f32 %v491_v20, %v490_v10  ;;  %v556_v41 = vrot.slane %v555_v2, 2  ;;  %vm321_vm5 = vweird.f32 %v1253_v63 }
  0xeb   :  { %v547_v36 = vrot.slane %v546_v23, 4  ;;  %v454_v38 = vadd.f32 %v944_v40, %v437_v6  ;;  %v320_v0 = vmul.f32 %v664_v11, %v319_v18  ;;  %v537_v28 = vrot.slane %v536_v44, 1  ;;  %vm323_vm6 = vmor %vm321_vm5, %vm322_vm4 }
  0xec   :  { %v544_v59 = vrot.slane %v543_v30, 1  ;;  %v220_v25 = vsub.f32 %v848_v50, %v1203_v3  ;;  %v499_v43 = vadd.f32 %v498_v48, %v497_v32  ;;  %v557_v15 = vadd.f32 %v556_v41, %v555_v2 }
  0xed   :  { %v548_v37 = vadd.f32 %v547_v36, %v546_v23  ;;  %v560_v24 = vsel %vm29_vm0, %v454_v38, 0.0  ;;  %v324_v19 = vsel %vm323_vm6, %v664_v11, %v320_v0  ;;  %v486_v22 = vrot.slane %v485_v56, 2 }
  0xee   :  { %v561_v5 = vrot.slane %v560_v24, 4  ;;  %v412_v7 = vmul.f32 %v324_v19, %v220_v25  ;;  %v531_v53 = vadd.f32 %v530_v62, %v1273_v13  ;;  %v480_v9 = vadd.f32 %v479_v34, %v478_v35 }
  0xef   :  { %v549_v14 = vrot.slane %v548_v37, 2  ;;  %v493_v8 = vrot.slane %v492_v33, 2  ;;  %v538_v16 = vadd.f32 %v537_v28, %v536_v44  ;;  %v500_v58 = vrot.slane %v499_v43, 2 }
  0xf0   :  { %v562_v49 = vadd.f32 %v561_v5, %v560_v24  ;;  %v429_v50 = vmul.f32 %v942_v39, %v412_v7  ;;  %v545_v3 = vadd.f32 %v544_v59, %v543_v30  ;;  %v558_v57 = vrot.slane %v557_v15, 1 }
  0xf1   :  { %v550_v63 = vadd.f32 %v549_v14, %v548_v37  ;;  %vm587_vm7 = vcmask 1043459   ;;  %v487_v10 = vadd.f32 %v486_v22, %v485_v56  ;;  %vm589_vm8 = vcmask 1044484  }
  0xf2   :  { %v563_v46 = vrot.slane %v562_v49, 2  ;;  %v446_v11 = vadd.f32 %v944_v40, %v429_v50  ;;  %v481_v27 = vrot.slane %v480_v9, 1  ;;  %v494_v54 = vadd.f32 %v493_v8, %v492_v33 }
  0xf3   :  { %v551_v17 = vrot.slane %v550_v63, 1  ;;  %v598_v35 = vsel %vm585_vm9, %v531_v53, %v597_v29  ;;  %v501_v26 = vadd.f32 %v500_v58, %v499_v43  ;;  %v559_v12 = vadd.f32 %v558_v57, %v557_v15 }
  0xf4   :  { %v504_v51 = vsel %vm29_vm0, %v446_v11, 0.0  ;;  %v564_v47 = vadd.f32 %v563_v46, %v562_v49  ;;  %v599_v39 = vsel %vm587_vm7, %v538_v16, %v598_v35  ;;  %vm591_vm10 = vcmask 1045509  }
  0xf5   :  { %v552_v13 = vadd.f32 %v551_v17, %v550_v63  ;;  %v505_v4 = vrot.slane %v504_v51, 4  ;;  %v600_v52 = vsel %vm589_vm8, %v545_v3, %v599_v39  ;;  %v488_v20 = vrot.slane %v487_v10, 1 }
  0xf6   :  { %v565_v32 = vrot.slane %v564_v47, 1  ;;  %vm593_vm11 = vcmask 1046534   ;;  %v495_v31 = vrot.slane %v494_v54, 1  ;;  %vm595_vm12 = vcmask 1047559  }
  0xf7   :  { %v601_v40 = vsel %vm591_vm10, %v552_v13, %v600_v52  ;;  %v506_v61 = vadd.f32 %v505_v4, %v504_v51  ;;  %v502_v42 = vrot.slane %v501_v26, 1  ;;  %vm606_vm9 = vcmask 261120  }
  0xf8   :  { %v566_v45 = vadd.f32 %v565_v32, %v564_v47  ;;  %v482_v60 = vadd.f32 %v481_v27, %v480_v9  ;;  %v602_v62 = vsel %vm593_vm11, %v559_v12, %v601_v40  ;;  %v489_v44 = vadd.f32 %v488_v20, %v487_v10 }
  0xf9   :  { %v507_v29 = vrot.slane %v506_v61, 2  ;;  %v496_v1 = vadd.f32 %v495_v31, %v494_v54  ;;  %v503_v48 = vadd.f32 %v502_v42, %v501_v26 }
  0xfa   :  { %v603_v55 = vsel %vm595_vm12, %v566_v45, %v602_v62  ;;  %v588_v23 = vsel %vm587_vm7, %v482_v60, %v1257_v21 }
  0xfb   :  { %v508_v30 = vadd.f32 %v507_v29, %v506_v61  ;;  %608 = vst.msk [vmem:[#allocation2 + $0x8] sm:$0xff] %vm606_vm9, %v603_v55  ;;  %v590_v36 = vsel %vm589_vm8, %v489_v44, %v588_v23 }
  0xfc   :  { %v592_v18 = vsel %vm591_vm10, %v496_v1, %v590_v36 }
  0xfd   :  { %v509_v2 = vrot.slane %v508_v30, 1  ;;  %v594_v34 = vsel %vm593_vm11, %v503_v48, %v592_v18 }
  0xff   :  { %v510_v6 = vadd.f32 %v509_v2, %v508_v30 }
 0x101   :  { %v596_v56 = vsel %vm595_vm12, %v510_v6, %v594_v34 }
 0x102   :  { %607 = vst.msk [vmem:[#allocation2] sm:$0xff] %vm606_vm9, %v596_v56 }
 0x103   :  { %621 = dma.vmem_to_hbm [thread:$0]  %s614_s14, 256, %s616_s17, [#allocation3], %s693_s18, %s693_s18, %s694_s19  }
 0x104   :  { %689 = dma.done.wait [#allocation3], 256  }
 0x105   :  { %690 = vsyncadd [#allocation3], 4294967040 }
 0x106   :  { %626 = vsyncpa [#allocation3], 1 }

// kernel: multiplex_transformer_temporal_encoder.5
= control target key start
LH: loop header
LB: loop body
LE: loop exit
PB: predicated region body
PF: predicated region fallthrough
CT: control target
= control target key end

     0   :  { %vm29_vm0 = vcmask 261120   ;;  %v1106_v16 = vmov 32.0   ;;  %s1107_s22 = smov 64   ;;  %s1108_s23 = smov 32   ;;  %vm309_vm14 = vcmask 130048   ;;  %s1530_s0 = inlined_call_operand.vmem [shape: f32[2,16,32], index: 0, kind: input, shape index: {}]   ;;  %s1531_s2 = inlined_call_operand.vmem [shape: f32[32,192], index: 2, kind: input, shape index: {}]   ;;  %s1532_s1 = inlined_call_operand.vmem [shape: f32[6,192], index: 1, kind: input, shape index: {}]   ;;  %s1533_s4 = inlined_call_operand.vmem [shape: f32[32,128], index: 4, kind: input, shape index: {}]   ;;  %s1534_s3 = inlined_call_operand.vmem [shape: f32[64,32], index: 3, kind: input, shape index: {}]   ;;  %s1535_s5 = inlined_call_operand.vmem [shape: f32[128,32], index: 5, kind: input, shape index: {}]   ;;  %s1536_s6 = inlined_call_operand.vmem [shape: f32[2,16,32], index: 6, kind: output, shape index: {}]  }
   0x1   :  { %v1148_v0 = vld [vmem:[%s1530_s0 + $0x10] sm:$0xff]  ;;  %v1153_v1 = vld [vmem:[%s1530_s0 + $0x8] sm:$0xff]  ;;  %v1158_v2 = vld [vmem:[%s1530_s0] sm:$0xff]  ;;  %1043 = vrcp.f32 %v1106_v16  ;;  %s1109_s24 = smov 96  }
   0x2   :  { %v36_v3 = vsel %vm29_vm0, %v1148_v0, 0.0  ;;  %v33_v4 = vsel %vm29_vm0, %v1153_v1, 0.0  ;;  %v30_v5 = vsel %vm29_vm0, %v1158_v2, 0.0  ;;  %v55_v6 = vmul.f32 %v1148_v0, %v1148_v0  ;;  %v1178_v12 = vld [vmem:[%s1530_s0 + $0x18] sm:$0xff]  ;;  %v149_v25 = vld [vmem:[%s1531_s2 + $0x30] sm:$0xff]  ;;  %v147_v30 = vld [vmem:[%s1531_s2 + $0x20] sm:$0xff] }
   0x3   :  { %37 = vadd.xlane.f32.xlu2 %v36_v3  ;;  %34 = vadd.xlane.f32.xlu1 %v33_v4  ;;  %v54_v7 = vmul.f32 %v1153_v1, %v1153_v1  ;;  %v53_v8 = vmul.f32 %v1158_v2, %v1158_v2  ;;  %v56_v13 = vmul.f32 %v1178_v12, %v1178_v12  ;;  %v39_v15 = vsel %vm29_vm0, %v1178_v12, 0.0  ;;  %v150_v26 = vld [vmem:[%s1531_s2 + $0x38] sm:$0xff]  ;;  %v148_v31 = vld [vmem:[%s1531_s2 + $0x28] sm:$0xff]  ;;  %v145_v32 = vld [vmem:[%s1531_s2 + $0x10] sm:$0xff] }
   0x4   :  { %31 = vadd.xlane.f32.xlu0 %v30_v5  ;;  %v63_v9 = vsel %vm29_vm0, %v55_v6, 0.0  ;;  %177 = vmatpush.msra.mxu0 %v149_v25  ;;  %v146_v33 = vld [vmem:[%s1531_s2 + $0x18] sm:$0xff]  ;;  %v143_v37 = vld [vmem:[%s1531_s2] sm:$0xff]  ;;  %v144_v38 = vld [vmem:[%s1531_s2 + $0x8] sm:$0xff] }
   0x5   :  { %v60_v10 = vsel %vm29_vm0, %v54_v7, 0.0  ;;  %v57_v11 = vsel %vm29_vm0, %v53_v8, 0.0  ;;  %v66_v14 = vsel %vm29_vm0, %v56_v13, 0.0  ;;  %206 = vmatpush.msra.mxu1 %v150_v26 }
   0x6   :  { %178 = vmatpush.msra.mxu0 %v147_v30 }
   0x7   :  { %v1044_v17 = vpop.eup %1043  ;;  %207 = vmatpush.msra.mxu1 %v148_v31 }
   0x8   :  { %v43_v18 = vmul.f32 32.0, %v1044_v17  ;;  %vm47_vm1 = vweird.f32 %v1044_v17  ;;  %179 = vmatpush.msra.mxu0 %v145_v32 }
   0x9   :  { %208 = vmatpush.msra.mxu1 %v146_v33 }
   0xa   :  { %v44_v19 = vsub.f32 1.0, %v43_v18  ;;  %180 = vmatpush.msra.mxu0 %v143_v37 }
   0xb   :  { %64 = vadd.xlane.f32.xlu2 %v63_v9  ;;  %61 = vadd.xlane.f32.xlu1 %v60_v10 }
   0xc   :  { %58 = vadd.xlane.f32.xlu0 %v57_v11  ;;  %v45_v20 = vmul.f32 %v1044_v17, %v44_v19  ;;  %209 = vmatpush.msra.mxu1 %v144_v38  ;;  %v1228_v11 = vld [vmem:[%s1532_s1] sm:$0x3f] }
   0xd   :  { %v133_v19 = vperm.slane %v1228_v11, 0 }
   0xe   :  { %v46_v21 = vadd.f32 %v1044_v17, %v45_v20 }
  0x10   :  { %v48_v27 = vsel %vm47_vm1, %v1044_v17, %v46_v21 }
  0x13   :  { %67 = vadd.xlane.f32.xlu1 %v66_v14 }
  0x14   :  { %40 = vadd.xlane.f32.xlu0 %v39_v15 }
  0x76   :  { %v38_v22 = vpop.xlane.xlu2 %37  ;;  %v35_v23 = vpop.xlane.xlu1 %34 }
  0x77   :  { %v32_v24 = vpop.xlane.xlu0 %31  ;;  %v1191_v28 = vmul.f32 %v48_v27, %v38_v22  ;;  %v1193_v29 = vmul.f32 %v48_v27, %v35_v23  ;;  %v138_v22 = vperm.slane %v1228_v11, 1 }
  0x78   :  { %v1207_v34 = vmul.f32 %v48_v27, %v32_v24 }
  0x79   :  { %v75_v35 = vmul.f32 %v1191_v28, %v1191_v28  ;;  %v74_v36 = vmul.f32 %v1193_v29, %v1193_v29  ;;  %v82_v26 = vsub.f32 %v1153_v1, %v1193_v29  ;;  %v83_v1 = vsub.f32 %v1148_v0, %v1191_v28 }
  0x7a   :  { %v73_v44 = vmul.f32 %v1207_v34, %v1207_v34  ;;  %v81_v17 = vsub.f32 %v1158_v2, %v1207_v34 }
  0x7e   :  { %v65_v39 = vpop.xlane.xlu2 %64  ;;  %v62_v40 = vpop.xlane.xlu1 %61 }
  0x7f   :  { %v71_v41 = vmul.f32 %v65_v39, %v48_v27  ;;  %v70_v42 = vmul.f32 %v62_v40, %v48_v27  ;;  %v59_v43 = vpop.xlane.xlu0 %58 }
  0x80   :  { %v69_v45 = vmul.f32 %v59_v43, %v48_v27 }
  0x81   :  { %v79_v46 = vsub.f32 %v71_v41, %v75_v35  ;;  %v78_v47 = vsub.f32 %v70_v42, %v74_v36 }
  0x82   :  { %v77_v48 = vsub.f32 %v69_v45, %v73_v44 }
  0x83   :  { %v87_v49 = vadd.f32 1e-05, %v79_v46  ;;  %v86_v50 = vadd.f32 1e-05, %v78_v47 }
  0x84   :  { %v85_v51 = vadd.f32 1e-05, %v77_v48 }
  0x85   :  { %1045 = vrsqrt.f32 %v87_v49  ;;  %vm105_vm6 = vweird.f32 %v86_v50  ;;  %vm115_vm8 = vweird.f32 %v87_v49 }
  0x86   :  { %1047 = vrsqrt.f32 %v86_v50  ;;  %v68_v52 = vpop.xlane.xlu1 %67  ;;  %vm95_vm3 = vweird.f32 %v85_v51 }
  0x87   :  { %1049 = vrsqrt.f32 %v85_v51  ;;  %v41_v53 = vpop.xlane.xlu0 %40  ;;  %v72_v55 = vmul.f32 %v68_v52, %v48_v27 }
  0x88   :  { %v1221_v54 = vmul.f32 %v48_v27, %v41_v53 }
  0x8a   :  { %v76_v56 = vmul.f32 %v1221_v54, %v1221_v54  ;;  %v84_v40 = vsub.f32 %v1178_v12, %v1221_v54  ;;  %v151_v12 = vperm.slane %v1228_v11, 2  ;;  %v28_v54 = vld [vmem:[%s1532_s1 + $0x8] sm:$0x3f] }
  0x8b   :  { %v1046_v57 = vpop.eup %1045 }
  0x8c   :  { %v1048_v58 = vpop.eup %1047  ;;  %v80_v59 = vsub.f32 %v72_v55, %v76_v56  ;;  %v110_v62 = vmul.f32 %v1046_v57, %v87_v49  ;;  %vm116_vm9 = vweird.f32 %v1046_v57  ;;  %v152_v56 = vperm.slane %v28_v54, 2 }
  0x8d   :  { %v1050_v60 = vpop.eup %1049  ;;  %v100_v61 = vmul.f32 %v1048_v58, %v86_v50  ;;  %vm106_vm4 = vweird.f32 %v1048_v58  ;;  %vm117_vm10 = vmor %vm115_vm8, %vm116_vm9 }
  0x8e   :  { %v90_v63 = vmul.f32 %v1050_v60, %v85_v51  ;;  %v88_v3 = vadd.f32 1e-05, %v80_v59  ;;  %v111_v7 = vmul.f32 %v1046_v57, %v110_v62  ;;  %vm96_vm2 = vweird.f32 %v1050_v60  ;;  %vm107_vm7 = vmor %vm105_vm6, %vm106_vm4 }
  0x8f   :  { %v101_v4 = vmul.f32 %v1048_v58, %v100_v61  ;;  %vm97_vm5 = vmor %vm95_vm3, %vm96_vm2 }
  0x90   :  { %v91_v5 = vmul.f32 %v1050_v60, %v90_v63  ;;  %1051 = vrsqrt.f32 %v88_v3  ;;  %v112_v14 = vmul.f32 0.5, %v111_v7  ;;  %vm125_vm11 = vweird.f32 %v88_v3 }
  0x91   :  { %v102_v6 = vmul.f32 0.5, %v101_v4 }
  0x92   :  { %v92_v8 = vmul.f32 0.5, %v91_v5  ;;  %v113_v23 = vsub.f32 1.5, %v112_v14 }
  0x93   :  { %v103_v9 = vsub.f32 1.5, %v102_v6 }
  0x94   :  { %v93_v10 = vsub.f32 1.5, %v92_v8  ;;  %v114_v31 = vmul.f32 %v1046_v57, %v113_v23 }
  0x95   :  { %v104_v15 = vmul.f32 %v1048_v58, %v103_v9 }
  0x96   :  { %v1052_v13 = vpop.eup %1051  ;;  %v94_v16 = vmul.f32 %v1050_v60, %v93_v10  ;;  %v118_v35 = vsel %vm117_vm10, %v1046_v57, %v114_v31 }
  0x97   :  { %v120_v18 = vmul.f32 %v1052_v13, %v88_v3  ;;  %v108_v25 = vsel %vm107_vm7, %v1048_v58, %v104_v15  ;;  %vm126_vm12 = vweird.f32 %v1052_v13  ;;  %v131_v36 = vmul.f32 %v118_v35, %v83_v1 }
  0x98   :  { %v98_v20 = vsel %vm97_vm5, %v1050_v60, %v94_v16  ;;  %v130_v2 = vmul.f32 %v108_v25, %v82_v26  ;;  %vm127_vm13 = vmor %vm125_vm11, %vm126_vm12 }
  0x99   :  { %v129_v21 = vmul.f32 %v98_v20, %v81_v17  ;;  %v121_v24 = vmul.f32 %v1052_v13, %v120_v18  ;;  %v136_v38 = vmul.f32 %v133_v19, %v131_v36 }
  0x9a   :  { %v135_v33 = vmul.f32 %v133_v19, %v130_v2 }
  0x9b   :  { %v134_v27 = vmul.f32 %v133_v19, %v129_v21  ;;  %v122_v32 = vmul.f32 0.5, %v121_v24  ;;  %v1252_v41 = vadd.f32 %v138_v22, %v136_v38 }
  0x9c   :  { %v1244_v29 = vadd.f32 %v138_v22, %v135_v33 }
  0x9d   :  { %v1236_v30 = vadd.f32 %v138_v22, %v134_v27  ;;  %v123_v34 = vsub.f32 1.5, %v122_v32 }
  0x9f   :  { %979 = vmatmul.msk.f32.vlgmr.msra.gmra.mxu0 %vm29_vm0, %v1236_v30  ;;  %983 = vmatmul.msk.f32.vlgmr.msra.gmra.mxu1 %vm29_vm0, %v1236_v30  ;;  %v124_v37 = vmul.f32 %v1052_v13, %v123_v34 }
  0xa1   :  { %v128_v39 = vsel %vm127_vm13, %v1052_v13, %v124_v37 }
  0xa2   :  { %v132_v0 = vmul.f32 %v128_v39, %v84_v40 }
  0xa4   :  { %v137_v28 = vmul.f32 %v133_v19, %v132_v0 }
  0xa6   :  { %v1258_v42 = vadd.f32 %v138_v22, %v137_v28 }
  0xa7   :  { %980 = vmatmul.msk.f32.gmra.mxu0 %vm29_vm0, %v1244_v29  ;;  %984 = vmatmul.msk.f32.gmra.mxu1 %vm29_vm0, %v1244_v29 }
  0xaf   :  { %981 = vmatmul.msk.f32.gmra.mxu0 %vm29_vm0, %v1252_v41  ;;  %985 = vmatmul.msk.f32.gmra.mxu1 %vm29_vm0, %v1252_v41 }
  0xb7   :  { %982 = vmatmul.msk.f32.gmra.mxu0 %vm29_vm0, %v1258_v42  ;;  %986 = vmatmul.msk.f32.gmra.mxu1 %vm29_vm0, %v1258_v42 }
 0x11c   :  { %v182_v43 = vpop.f32.mrf.mxu0  ;;  %v211_v52 = vpop.f32.mrf.mxu1 }
 0x11d   :  { %v183_v44 = vadd.f32 %v182_v43, %v151_v12  ;;  %v1277_v60 = vadd.f32 %v211_v52, %v152_v56 }
 0x11f   :  { %233 = vrot.lane.b32.xlu0 %v183_v44, %s1107_s22 }
 0x124   :  { %v185_v45 = vpop.f32.mrf.mxu0  ;;  %v214_v55 = vpop.f32.mrf.mxu1 }
 0x125   :  { %v186_v46 = vadd.f32 %v185_v45, %v151_v12  ;;  %v1273_v57 = vadd.f32 %v214_v55, %v152_v56 }
 0x127   :  { %235 = vrot.lane.b32.xlu2 %v186_v46, %s1107_s22  ;;  %470 = vrot.lane.b32.xlu0 %v186_v46, %s1108_s23 }
 0x12c   :  { %v188_v47 = vpop.f32.mrf.mxu0  ;;  %v217_v62 = vpop.f32.mrf.mxu1 }
 0x12d   :  { %v189_v48 = vadd.f32 %v188_v47, %v151_v12  ;;  %v1291_v6 = vadd.f32 %v217_v62, %v152_v56 }
 0x12f   :  { %270 = vrot.lane.b32.xlu2 %v189_v48, %s1107_s22  ;;  %466 = vrot.lane.b32.xlu0 %v186_v46, %s1109_s24 }
 0x134   :  { %v191_v49 = vpop.f32.mrf.mxu0  ;;  %v220_v4 = vpop.f32.mrf.mxu1 }
 0x135   :  { %v192_v50 = vadd.f32 %v191_v49, %v151_v12  ;;  %v1285_v5 = vadd.f32 %v220_v4, %v152_v56  ;;  %v1033_v12 = vpack.i.bf16 %v1277_v60, %v1273_v57 }
 0x137   :  { %468 = vrot.lane.b32.xlu2 %v183_v44, %s1108_s23  ;;  %503 = vrot.lane.b32.xlu0 %v189_v48, %s1109_s24 }
 0x138   :  { %272 = vrot.lane.b32.xlu1 %v192_v50, %s1107_s22 }
 0x13f   :  { %509 = vrot.lane.b32.xlu2 %v192_v50, %s1108_s23 }
 0x140   :  { %464 = vrot.lane.b32.xlu1 %v183_v44, %s1109_s24 }
 0x147   :  { %505 = vrot.lane.b32.xlu2 %v192_v50, %s1109_s24 }
 0x148   :  { %507 = vrot.lane.b32.xlu1 %v189_v48, %s1108_s23 }
 0x181   :  { %v236_v51 = vpop.permute.xlu2 %235 }
 0x182   :  { %987 = vmatpush.xpose.msk.msra.mxu2 %vm29_vm0, %v236_v51 }
 0x189   :  { %v271_v53 = vpop.permute.xlu2 %270 }
 0x191   :  { %v469_v58 = vpop.permute.xlu2 %468  ;;  %v234_v59 = vpop.permute.xlu0 %233 }
 0x192   :  { %988 = vmatpush.xpose.msk.msra.mxu2 %vm29_vm0, %v234_v59 }
 0x195   :  { %989 = vmatmul.msk.f32.vlgmr.msra.gmra.mxu2 %vm29_vm0, %v183_v44 }
 0x196   :  { %426 = vmatpush.msrb.mxu2 %v1273_v57 }
 0x198   :  { %427 = vmatpush.msrb.mxu2 %v1277_v60 }
 0x199   :  { %v510_v61 = vpop.permute.xlu2 %509  ;;  %v471_v63 = vpop.permute.xlu0 %470 }
 0x19a   :  { %1003 = vmatpush.xpose.msk.msrb.mxu1 %vm29_vm0, %v510_v61 }
 0x19d   :  { %990 = vmatmul.msk.f32.gmra.mxu2 %vm29_vm0, %v186_v46 }
 0x1a1   :  { %v467_v8 = vpop.permute.xlu0 %466  ;;  %v506_v13 = vpop.permute.xlu2 %505 }
 0x1a9   :  { %v504_v10 = vpop.permute.xlu0 %503 }
 0x1aa   :  { %v273_v3 = vpop.permute.xlu1 %272 }
 0x1ab   :  { %991 = vmatpush.xpose.msk.msrb.mxu0 %vm29_vm0, %v273_v3  ;;  %1027 = vmatpush.xpose.msk.msra.mxu3 %vm29_vm0, %v273_v3 }
 0x1af   :  { %992 = vmatpush.xpose.msk.msrb.mxu0 %vm29_vm0, %v271_v53  ;;  %1028 = vmatpush.xpose.msk.msra.mxu3 %vm29_vm0, %v271_v53 }
 0x1b2   :  { %993 = vmatmul.msk.f32.vlgmr.msrb.gmra.mxu0 %vm29_vm0, %v189_v48  ;;  %994 = vmatmul.msk.f32.vlgmr.msra.gmra.mxu3 %vm29_vm0, %v192_v50  ;;  %v465_v7 = vpop.permute.xlu1 %464 }
 0x1b3   :  { %455 = vmatpush.msrb.mxu3 %v1285_v5  ;;  %999 = vmatpush.xpose.msk.msra.mxu0 %vm29_vm0, %v471_v63 }
 0x1b5   :  { %456 = vmatpush.msrb.mxu3 %v1291_v6 }
 0x1b7   :  { %1000 = vmatpush.xpose.msk.msra.mxu0 %vm29_vm0, %v469_v58 }
 0x1ba   :  { %v508_v9 = vpop.permute.xlu1 %507  ;;  %1001 = vmatmul.msk.f32.vlgmr.msra.gmra.mxu0 %vm29_vm0, %v465_v7 }
 0x1bb   :  { %1004 = vmatpush.xpose.msk.msrb.mxu1 %vm29_vm0, %v508_v9 }
 0x1be   :  { %1005 = vmatmul.msk.f32.vlgmr.msrb.gmra.mxu1 %vm29_vm0, %v504_v10 }
 0x1c2   :  { %1002 = vmatmul.msk.f32.gmra.mxu0 %vm29_vm0, %v467_v8 }
 0x1c6   :  { %1006 = vmatmul.msk.f32.gmra.mxu1 %vm29_vm0, %v506_v13 }
 0x218   :  { %v262_v14 = vpop.f32.mrf.mxu2 }
 0x219   :  { %v305_v15 = vmul.f32 0.17677669, %v262_v14 }
 0x21b   :  { %v310_v16 = vsel %vm309_vm14, %v305_v15, -inf }
 0x21c   :  { %311 = vmax.xlane.f32.xlu1 %v310_v16 }
 0x220   :  { %v265_v17 = vpop.f32.mrf.mxu2 }
 0x221   :  { %v306_v18 = vmul.f32 0.17677669, %v265_v17 }
 0x223   :  { %v313_v19 = vsel %vm309_vm14, %v306_v18, -inf }
 0x224   :  { %314 = vmax.xlane.f32.xlu0 %v313_v19 }
 0x22f   :  { %v299_v20 = vpop.f32.mrf.mxu0 }
 0x230   :  { %v307_v36 = vmul.f32 0.17677669, %v299_v20 }
 0x232   :  { %v316_v38 = vsel %vm309_vm14, %v307_v36, -inf }
 0x235   :  { %v302_v49 = vpop.f32.mrf.mxu3 }
 0x236   :  { %v1322_v50 = vmul.f32 0.17677669, %v302_v49 }
 0x237   :  { %v497_v21 = vpop.f32.mrf.mxu0 }
 0x238   :  { %v542_v22 = vmul.f32 0.17677669, %v497_v21  ;;  %v319_v52 = vsel %vm309_vm14, %v1322_v50, -inf }
 0x23a   :  { %v546_v23 = vsel %vm309_vm14, %v542_v22, -inf }
 0x23b   :  { %547 = vmax.xlane.f32.xlu2 %v546_v23  ;;  %v536_v46 = vpop.f32.mrf.mxu1 }
 0x23c   :  { %v1330_v55 = vmul.f32 0.17677669, %v536_v46 }
 0x23e   :  { %v552_v58 = vsel %vm309_vm14, %v1330_v55, -inf }
 0x23f   :  { %v500_v24 = vpop.f32.mrf.mxu0 }
 0x240   :  { %v543_v25 = vmul.f32 0.17677669, %v500_v24 }
 0x242   :  { %v549_v26 = vsel %vm309_vm14, %v543_v25, -inf }
 0x243   :  { %550 = vmax.xlane.f32.xlu1 %v549_v26  ;;  %v539_v54 = vpop.f32.mrf.mxu1 }
 0x244   :  { %v1332_v56 = vmul.f32 0.17677669, %v539_v54 }
 0x246   :  { %v555_v57 = vsel %vm309_vm14, %v1332_v56, -inf }
 0x28f   :  { %v312_v27 = vpop.xlane.xlu1 %311 }
 0x290   :  { %v322_v2 = vsub.f32 %v305_v15, %v312_v27 }
 0x292   :  { %v326_v31 = vmul.f32 1.442695, %v322_v2 }
 0x294   :  { %1053 = vpow2.f32 %v326_v31 }
 0x297   :  { %v315_v32 = vpop.xlane.xlu0 %314 }
 0x298   :  { %v323_v33 = vsub.f32 %v306_v18, %v315_v32 }
 0x29a   :  { %v1306_v34 = vpop.eup %1053  ;;  %v328_v35 = vmul.f32 1.442695, %v323_v33 }
 0x29b   :  { %v334_v1 = vsel %vm309_vm14, %v1306_v34, 0.0 }
 0x29c   :  { %1055 = vpow2.f32 %v328_v35  ;;  %335 = vadd.xlane.f32.xlu0 %v334_v1  ;;  %v806_v1 = vld [vmem:[%s1533_s4 + $0x18] sm:$0xff] }
 0x2a2   :  { %v1310_v37 = vpop.eup %1055 }
 0x2a3   :  { %v337_v39 = vsel %vm309_vm14, %v1310_v37, 0.0 }
 0x2a4   :  { %317 = vmax.xlane.f32.xlu0 %v316_v38  ;;  %338 = vadd.xlane.f32.xlu2 %v337_v39  ;;  %v805_v38 = vld [vmem:[%s1533_s4 + $0x10] sm:$0xff]  ;;  %v803_v39 = vld [vmem:[%s1533_s4] sm:$0xff] }
 0x2ae   :  { %v548_v40 = vpop.xlane.xlu2 %547 }
 0x2af   :  { %v558_v0 = vsub.f32 %v542_v22, %v548_v40 }
 0x2b1   :  { %v562_v28 = vmul.f32 1.442695, %v558_v0 }
 0x2b3   :  { %1057 = vpow2.f32 %v562_v28 }
 0x2b6   :  { %v551_v43 = vpop.xlane.xlu1 %550 }
 0x2b7   :  { %v559_v44 = vsub.f32 %v543_v25, %v551_v43 }
 0x2b8   :  { %1034 = vrot.lane.b32.xlu0 %v1033_v12, %s1109_s24 }
 0x2b9   :  { %v1318_v45 = vpop.eup %1057  ;;  %v564_v47 = vmul.f32 1.442695, %v559_v44 }
 0x2ba   :  { %v570_v48 = vsel %vm309_vm14, %v1318_v45, 0.0 }
 0x2bb   :  { %1059 = vpow2.f32 %v564_v47  ;;  %571 = vadd.xlane.f32.xlu1 %v570_v48 }
 0x2c1   :  { %v1324_v51 = vpop.eup %1059 }
 0x2c2   :  { %v573_v53 = vsel %vm309_vm14, %v1324_v51, 0.0 }
 0x2c3   :  { %320 = vmax.xlane.f32.xlu1 %v319_v52  ;;  %574 = vadd.xlane.f32.xlu2 %v573_v53 }
 0x2cb   :  { %556 = vmax.xlane.f32.xlu1 %v555_v57  ;;  %553 = vmax.xlane.f32.xlu2 %v552_v58 }
 0x30f   :  { %v336_v59 = vpop.xlane.xlu0 %335 }
 0x310   :  { %1061 = vrcp.f32 %v336_v59  ;;  %v357_v7 = vand.u32 2147483648, %v336_v59  ;;  %v355_v10 = vand.u32 2147483647, %v336_v59  ;;  %vm351_vm1 = vweird.f32 %v336_v59 }
 0x312   :  { %v358_v15 = vor.u32 1.1754944e-38, %v357_v7  ;;  %vm356_vm3 = vcmp.eq.f32.partialorder %v355_v10, 8.507059e+37 }
 0x316   :  { %v1062_v60 = vpop.eup %1061 }
 0x317   :  { %v347_v61 = vmul.f32 %v1062_v60, %v336_v59  ;;  %v339_v62 = vpop.xlane.xlu2 %338  ;;  %v318_v63 = vpop.xlane.xlu0 %317  ;;  %vm352_vm15 = vweird.f32 %v1062_v60 }
 0x318   :  { %1063 = vrcp.f32 %v339_v62  ;;  %v324_v3 = vsub.f32 %v307_v36, %v318_v63  ;;  %vm353_vm2 = vmor %vm351_vm1, %vm352_vm15  ;;  %v372_v22 = vand.u32 2147483648, %v339_v62  ;;  %v370_v25 = vand.u32 2147483647, %v339_v62 }
 0x319   :  { %v348_v4 = vsub.f32 1.0, %v347_v61  ;;  %vm366_vm5 = vweird.f32 %v339_v62 }
 0x31a   :  { %v330_v8 = vmul.f32 1.442695, %v324_v3  ;;  %v373_v27 = vor.u32 1.1754944e-38, %v372_v22  ;;  %vm371_vm7 = vcmp.eq.f32.partialorder %v370_v25, 8.507059e+37  ;;  %v226_v22 = vld [vmem:[%s1534_s3 + $0x18] sm:$0xff] }
 0x31b   :  { %v349_v9 = vmul.f32 %v1062_v60, %v348_v4  ;;  %781 = vmatpush.msra.mxu1 %v226_v22  ;;  %v931_v22 = vld [vmem:[%s1535_s5 + $0x70] sm:$0xff] }
 0x31c   :  { %1065 = vpow2.f32 %v330_v8 }
 0x31d   :  { %v350_v13 = vadd.f32 %v1062_v60, %v349_v9 }
 0x31e   :  { %v1064_v14 = vpop.eup %1063 }
 0x31f   :  { %v362_v16 = vmul.f32 %v1064_v14, %v339_v62  ;;  %v354_v17 = vsel %vm353_vm2, %v1062_v60, %v350_v13  ;;  %vm367_vm4 = vweird.f32 %v1064_v14 }
 0x320   :  { %v359_v18 = vsel %vm356_vm3, %v358_v15, %v354_v17  ;;  %vm368_vm6 = vmor %vm366_vm5, %vm367_vm4 }
 0x321   :  { %v363_v19 = vsub.f32 1.0, %v362_v16  ;;  %v360_v20 = vmul.f32 %v1306_v34, %v359_v18 }
 0x322   :  { %v1339_v21 = vpop.eup %1065 }
 0x323   :  { %v364_v23 = vmul.f32 %v1064_v14, %v363_v19  ;;  %995 = vmatmul.msk.f32.vlgmr.msrb.gmra.mxu2 %vm309_vm14, %v360_v20  ;;  %v340_v24 = vsel %vm309_vm14, %v1339_v21, 0.0 }
 0x324   :  { %341 = vadd.xlane.f32.xlu2 %v340_v24 }
 0x325   :  { %v365_v26 = vadd.f32 %v1064_v14, %v364_v23  ;;  %v230_v23 = vld [vmem:[%s1534_s3 + $0x38] sm:$0xff] }
 0x326   :  { %740 = vmatpush.msrb.mxu0 %v230_v23 }
 0x327   :  { %v369_v2 = vsel %vm368_vm6, %v1064_v14, %v365_v26  ;;  %v229_v26 = vld [vmem:[%s1534_s3 + $0x30] sm:$0xff] }
 0x328   :  { %v374_v31 = vsel %vm371_vm7, %v373_v27, %v369_v2  ;;  %741 = vmatpush.msrb.mxu0 %v229_v26 }
 0x329   :  { %v375_v32 = vmul.f32 %v1310_v37, %v374_v31  ;;  %v804_v37 = vld [vmem:[%s1533_s4 + $0x8] sm:$0xff] }
 0x32a   :  { %v1035_v33 = vpop.permute.xlu0 %1034  ;;  %v228_v31 = vld [vmem:[%s1534_s3 + $0x28] sm:$0xff] }
 0x32b   :  { %v1036_v34 = vunpack.i.l.bf16 %v1035_v33  ;;  %996 = vmatmul.msk.f32.gmra.mxu2 %vm309_vm14, %v375_v32  ;;  %v1037_v35 = vunpack.i.h.bf16 %v1035_v33  ;;  %742 = vmatpush.msrb.mxu0 %v228_v31 }
 0x32d   :  { %670 = vmatpush.msra.mxu2 %v1036_v34 }
 0x32e   :  { %v572_v36 = vpop.xlane.xlu1 %571 }
 0x32f   :  { %1067 = vrcp.f32 %v572_v36  ;;  %671 = vmatpush.msra.mxu2 %v1037_v35  ;;  %v593_v46 = vand.u32 2147483648, %v572_v36  ;;  %v591_v49 = vand.u32 2147483647, %v572_v36  ;;  %vm587_vm9 = vweird.f32 %v572_v36  ;;  %v227_v35 = vld [vmem:[%s1534_s3 + $0x20] sm:$0xff] }
 0x330   :  { %743 = vmatpush.msrb.mxu0 %v227_v35  ;;  %v923_v35 = vld [vmem:[%s1535_s5 + $0x30] sm:$0xff] }
 0x331   :  { %820 = vmatpush.msrb.mxu2 %v806_v1  ;;  %v594_v54 = vor.u32 1.1754944e-38, %v593_v46  ;;  %vm592_vm11 = vcmp.eq.f32.partialorder %v591_v49, 8.507059e+37 }
 0x333   :  { %821 = vmatpush.msrb.mxu2 %v805_v38 }
 0x335   :  { %822 = vmatpush.msrb.mxu2 %v804_v37  ;;  %v1068_v40 = vpop.eup %1067 }
 0x336   :  { %v583_v0 = vmul.f32 %v1068_v40, %v572_v36  ;;  %v321_v28 = vpop.xlane.xlu1 %320  ;;  %v575_v12 = vpop.xlane.xlu2 %574  ;;  %vm588_vm8 = vweird.f32 %v1068_v40 }
 0x337   :  { %823 = vmatpush.msrb.mxu2 %v803_v39  ;;  %v325_v43 = vsub.f32 %v1322_v50, %v321_v28  ;;  %1069 = vrcp.f32 %v575_v12  ;;  %vm589_vm10 = vmor %vm587_vm9, %vm588_vm8  ;;  %v608_v7 = vand.u32 2147483648, %v575_v12  ;;  %v606_v14 = vand.u32 2147483647, %v575_v12 }
 0x338   :  { %v584_v44 = vsub.f32 1.0, %v583_v0  ;;  %vm602_vm13 = vweird.f32 %v575_v12 }
 0x339   :  { %v332_v47 = vmul.f32 1.442695, %v325_v43  ;;  %vm607_vm1 = vcmp.eq.f32.partialorder %v606_v14, 8.507059e+37 }
 0x33a   :  { %v585_v48 = vmul.f32 %v1068_v40, %v584_v44 }
 0x33b   :  { %1071 = vpow2.f32 %v332_v47 }
 0x33c   :  { %v586_v52 = vadd.f32 %v1068_v40, %v585_v48 }
 0x33d   :  { %v1070_v53 = vpop.eup %1069 }
 0x33e   :  { %v590_v57 = vsel %vm589_vm10, %v1068_v40, %v586_v52  ;;  %v598_v58 = vmul.f32 %v1070_v53, %v575_v12  ;;  %v557_v59 = vpop.xlane.xlu1 %556  ;;  %v554_v60 = vpop.xlane.xlu2 %553  ;;  %vm603_vm12 = vweird.f32 %v1070_v53 }
 0x33f   :  { %v595_v61 = vsel %vm592_vm11, %v594_v54, %v590_v57  ;;  %v561_v50 = vsub.f32 %v1332_v56, %v557_v59  ;;  %v560_v62 = vsub.f32 %v1330_v55, %v554_v60  ;;  %v609_v56 = vor.u32 1.1754944e-38, %v608_v7  ;;  %vm604_vm15 = vmor %vm602_vm13, %vm603_vm12 }
 0x340   :  { %v599_v63 = vsub.f32 1.0, %v598_v58  ;;  %v596_v3 = vmul.f32 %v1318_v45, %v595_v61 }
 0x341   :  { %v1362_v4 = vpop.eup %1071  ;;  %v568_v8 = vmul.f32 1.442695, %v561_v50  ;;  %v566_v9 = vmul.f32 1.442695, %v560_v62 }
 0x342   :  { %v600_v10 = vmul.f32 %v1070_v53, %v599_v63  ;;  %1007 = vmatmul.msk.f32.vlgmr.msra.gmra.mxu2 %vm309_vm14, %v596_v3  ;;  %v343_v13 = vsel %vm309_vm14, %v1362_v4, 0.0 }
 0x343   :  { %1073 = vpow2.f32 %v568_v8  ;;  %344 = vadd.xlane.f32.xlu1 %v343_v13 }
 0x344   :  { %1075 = vpow2.f32 %v566_v9  ;;  %v601_v55 = vadd.f32 %v1070_v53, %v600_v10 }
 0x346   :  { %v605_v45 = vsel %vm604_vm15, %v1070_v53, %v601_v55 }
 0x347   :  { %v610_v15 = vsel %vm607_vm1, %v609_v56, %v605_v45 }
 0x348   :  { %v611_v16 = vmul.f32 %v1324_v51, %v610_v15  ;;  %v1038_v51 = vpack.i.bf16 %v1291_v6, %v1285_v5 }
 0x349   :  { %v1368_v17 = vpop.eup %1073 }
 0x34a   :  { %v1370_v18 = vpop.eup %1075  ;;  %1008 = vmatmul.msk.f32.gmra.mxu2 %vm309_vm14, %v611_v16  ;;  %v579_v19 = vsel %vm309_vm14, %v1368_v17, 0.0 }
 0x34b   :  { %580 = vadd.xlane.f32.xlu0 %v579_v19  ;;  %v576_v20 = vsel %vm309_vm14, %v1370_v18, 0.0 }
 0x34c   :  { %577 = vadd.xlane.f32.xlu2 %v576_v20  ;;  %v1422_v20 = vperm.slane %v1228_v11, 4 }
 0x352   :  { %1019 = vmatmul.msk.f32.vlgmr.msrb.gmra.mxu2 %vm29_vm0, %v1236_v30  ;;  %v225_v30 = vld [vmem:[%s1534_s3 + $0x10] sm:$0xff] }
 0x353   :  { %782 = vmatpush.msra.mxu1 %v225_v30 }
 0x35a   :  { %1020 = vmatmul.msk.f32.gmra.mxu2 %vm29_vm0, %v1244_v29  ;;  %v224_v29 = vld [vmem:[%s1534_s3 + $0x8] sm:$0xff] }
 0x35b   :  { %783 = vmatpush.msra.mxu1 %v224_v29 }
 0x35c   :  { %1039 = vrot.lane.b32.xlu1 %v1038_v51, %s1109_s24  ;;  %v932_v51 = vld [vmem:[%s1535_s5 + $0x78] sm:$0xff] }
 0x362   :  { %1021 = vmatmul.msk.f32.gmra.mxu2 %vm29_vm0, %v1252_v41  ;;  %v223_v41 = vld [vmem:[%s1534_s3] sm:$0xff] }
 0x363   :  { %784 = vmatpush.msra.mxu1 %v223_v41  ;;  %v930_v41 = vld [vmem:[%s1535_s5 + $0x68] sm:$0xff] }
 0x36a   :  { %1022 = vmatmul.msk.f32.gmra.mxu2 %vm29_vm0, %v1258_v42 }
 0x397   :  { %v342_v42 = vpop.xlane.xlu2 %341 }
 0x398   :  { %1077 = vrcp.f32 %v342_v42  ;;  %v387_v25 = vand.u32 2147483648, %v342_v42  ;;  %v385_v2 = vand.u32 2147483647, %v342_v42  ;;  %vm381_vm3 = vweird.f32 %v342_v42 }
 0x39a   :  { %v388_v33 = vor.u32 1.1754944e-38, %v387_v25  ;;  %vm386_vm5 = vcmp.eq.f32.partialorder %v385_v2, 8.507059e+37  ;;  %v927_v25 = vld [vmem:[%s1535_s5 + $0x50] sm:$0xff] }
 0x39e   :  { %v1078_v5 = vpop.eup %1077 }
 0x39f   :  { %v377_v6 = vmul.f32 %v1078_v5, %v342_v42  ;;  %vm382_vm2 = vweird.f32 %v1078_v5 }
 0x3a0   :  { %vm383_vm4 = vmor %vm381_vm3, %vm382_vm2 }
 0x3a1   :  { %v378_v24 = vsub.f32 1.0, %v377_v6  ;;  %v929_v6 = vld [vmem:[%s1535_s5 + $0x60] sm:$0xff] }
 0x3a3   :  { %v379_v27 = vmul.f32 %v1078_v5, %v378_v24  ;;  %v928_v24 = vld [vmem:[%s1535_s5 + $0x58] sm:$0xff] }
 0x3a5   :  { %v380_v32 = vadd.f32 %v1078_v5, %v379_v27 }
 0x3a6   :  { %v429_v34 = vpop.f32.mrf.mxu2 }
 0x3a7   :  { %1015 = vmatmul.msk.f32.vlgmr.msra.gmra.mxu1 %vm29_vm0, %v429_v34  ;;  %v384_v1 = vsel %vm383_vm4, %v1078_v5, %v380_v32  ;;  %v925_v32 = vld [vmem:[%s1535_s5 + $0x40] sm:$0xff]  ;;  %v924_v34 = vld [vmem:[%s1535_s5 + $0x38] sm:$0xff] }
 0x3a8   :  { %v389_v36 = vsel %vm386_vm5, %v388_v33, %v384_v1 }
 0x3a9   :  { %v390_v38 = vmul.f32 %v1339_v21, %v389_v36 }
 0x3ab   :  { %997 = vmatmul.msk.f32.vlgmr.msrb.gmra.mxu3 %vm309_vm14, %v390_v38  ;;  %v922_v38 = vld [vmem:[%s1535_s5 + $0x28] sm:$0xff] }
 0x3ae   :  { %v432_v37 = vpop.f32.mrf.mxu2 }
 0x3af   :  { %1016 = vmatmul.msk.f32.gmra.mxu1 %vm29_vm0, %v432_v37 }
 0x3b6   :  { %v345_v39 = vpop.xlane.xlu1 %344 }
 0x3b7   :  { %1079 = vrcp.f32 %v345_v39  ;;  %v402_v44 = vand.u32 2147483648, %v345_v39  ;;  %v400_v47 = vand.u32 2147483647, %v345_v39  ;;  %vm396_vm7 = vweird.f32 %v345_v39 }
 0x3b9   :  { %v403_v49 = vor.u32 1.1754944e-38, %v402_v44  ;;  %vm401_vm9 = vcmp.eq.f32.partialorder %v400_v47, 8.507059e+37 }
 0x3bd   :  { %v1080_v40 = vpop.eup %1079 }
 0x3be   :  { %v392_v0 = vmul.f32 %v1080_v40, %v345_v39  ;;  %v581_v28 = vpop.xlane.xlu0 %580  ;;  %vm397_vm6 = vweird.f32 %v1080_v40 }
 0x3bf   :  { %v578_v12 = vpop.xlane.xlu2 %577  ;;  %1081 = vrcp.f32 %v581_v28  ;;  %vm398_vm8 = vmor %vm396_vm7, %vm397_vm6  ;;  %v638_v45 = vand.u32 2147483648, %v581_v28  ;;  %vm632_vm1 = vweird.f32 %v581_v28  ;;  %v636_v19 = vand.u32 2147483647, %v581_v28 }
 0x3c0   :  { %v393_v43 = vsub.f32 1.0, %v392_v0  ;;  %1083 = vrcp.f32 %v578_v12  ;;  %v623_v62 = vand.u32 2147483648, %v578_v12  ;;  %v621_v3 = vand.u32 2147483647, %v578_v12 }
 0x3c1   :  { %vm617_vm11 = vweird.f32 %v578_v12  ;;  %v639_v29 = vor.u32 1.1754944e-38, %v638_v45  ;;  %vm637_vm3 = vcmp.eq.f32.partialorder %v636_v19, 8.507059e+37 }
 0x3c2   :  { %v394_v46 = vmul.f32 %v1080_v40, %v393_v43  ;;  %v624_v10 = vor.u32 1.1754944e-38, %v623_v62  ;;  %vm622_vm13 = vcmp.eq.f32.partialorder %v621_v3, 8.507059e+37  ;;  %v920_v43 = vld [vmem:[%s1535_s5 + $0x18] sm:$0xff] }
 0x3c4   :  { %v395_v21 = vadd.f32 %v1080_v40, %v394_v46  ;;  %v919_v46 = vld [vmem:[%s1535_s5 + $0x10] sm:$0xff] }
 0x3c5   :  { %v1082_v48 = vpop.eup %1081  ;;  %v673_v52 = vpop.f32.mrf.mxu2 }
 0x3c6   :  { %v1084_v53 = vpop.eup %1083  ;;  %v628_v54 = vmul.f32 %v1082_v48, %v581_v28  ;;  %1011 = vmatmul.msk.f32.vlgmr.msrb.gmra.mxu0 %vm29_vm0, %v673_v52  ;;  %v399_v57 = vsel %vm398_vm8, %v1080_v40, %v395_v21  ;;  %vm633_vm15 = vweird.f32 %v1082_v48  ;;  %v921_v40 = vld [vmem:[%s1535_s5 + $0x20] sm:$0xff] }
 0x3c7   :  { %v613_v58 = vmul.f32 %v1084_v53, %v578_v12  ;;  %v404_v59 = vsel %vm401_vm9, %v403_v49, %v399_v57  ;;  %vm618_vm10 = vweird.f32 %v1084_v53  ;;  %vm634_vm2 = vmor %vm632_vm1, %vm633_vm15 }
 0x3c8   :  { %v629_v60 = vsub.f32 1.0, %v628_v54  ;;  %v405_v61 = vmul.f32 %v1362_v4, %v404_v59  ;;  %vm619_vm12 = vmor %vm617_vm11, %vm618_vm10  ;;  %v917_v59 = vld [vmem:[%s1535_s5] sm:$0xff] }
 0x3c9   :  { %v614_v50 = vsub.f32 1.0, %v613_v58 }
 0x3ca   :  { %998 = vmatmul.msk.f32.gmra.mxu3 %vm309_vm14, %v405_v61  ;;  %v630_v7 = vmul.f32 %v1082_v48, %v629_v60 }
 0x3cb   :  { %v615_v63 = vmul.f32 %v1084_v53, %v614_v50 }
 0x3cc   :  { %v631_v56 = vadd.f32 %v1082_v48, %v630_v7 }
 0x3cd   :  { %v616_v8 = vadd.f32 %v1084_v53, %v615_v63  ;;  %v676_v9 = vpop.f32.mrf.mxu2 }
 0x3ce   :  { %v1040_v13 = vpop.permute.xlu1 %1039  ;;  %1012 = vmatmul.msk.f32.gmra.mxu0 %vm29_vm0, %v676_v9  ;;  %v635_v30 = vsel %vm634_vm2, %v1082_v48, %v631_v56 }
 0x3cf   :  { %v620_v14 = vsel %vm619_vm12, %v1084_v53, %v616_v8  ;;  %v1041_v55 = vunpack.i.l.bf16 %v1040_v13  ;;  %v1042_v15 = vunpack.i.h.bf16 %v1040_v13  ;;  %v640_v42 = vsel %vm637_vm3, %v639_v29, %v635_v30  ;;  %v918_v53 = vld [vmem:[%s1535_s5 + $0x8] sm:$0xff] }
 0x3d0   :  { %v625_v4 = vsel %vm622_vm13, %v624_v10, %v620_v14  ;;  %v641_v23 = vmul.f32 %v1368_v17, %v640_v42  ;;  %v926_v17 = vld [vmem:[%s1535_s5 + $0x48] sm:$0xff] }
 0x3d1   :  { %707 = vmatpush.msra.mxu3 %v1041_v55  ;;  %v626_v16 = vmul.f32 %v1370_v18, %v625_v4 }
 0x3d3   :  { %708 = vmatpush.msra.mxu3 %v1042_v15 }
 0x3d4   :  { %1009 = vmatmul.msk.f32.vlgmr.msra.gmra.mxu3 %vm309_vm14, %v626_v16 }
 0x3d5   :  { %v825_v18 = vpop.f32.mrf.mxu2  ;;  %934 = vmatpush.msrb.mxu3 %v932_v51 }
 0x3d6   :  { %v1432_v11 = vadd.f32 %v825_v18, %v1422_v20 }
 0x3d7   :  { %935 = vmatpush.msrb.mxu3 %v931_v22 }
 0x3d8   :  { %v1023_v5 = vmul.f32 -1.442695, %v1432_v11 }
 0x3d9   :  { %936 = vmatpush.msrb.mxu3 %v930_v41 }
 0x3da   :  { %1085 = vpow2.f32 %v1023_v5 }
 0x3db   :  { %937 = vmatpush.msrb.mxu3 %v929_v6 }
 0x3dc   :  { %1010 = vmatmul.msk.f32.gmra.mxu3 %vm309_vm14, %v641_v23 }
 0x3dd   :  { %v828_v26 = vpop.f32.mrf.mxu2  ;;  %938 = vmatpush.msrb.mxu3 %v928_v24 }
 0x3de   :  { %v1450_v27 = vadd.f32 %v828_v26, %v1422_v20 }
 0x3df   :  { %939 = vmatpush.msrb.mxu3 %v927_v25 }
 0x3e0   :  { %v1086_v2 = vpop.eup %1085  ;;  %v1024_v31 = vmul.f32 -1.442695, %v1450_v27 }
 0x3e1   :  { %v849_v33 = vadd.f32 1.0, %v1086_v2  ;;  %940 = vmatpush.msrb.mxu3 %v926_v17 }
 0x3e2   :  { %1087 = vpow2.f32 %v1024_v31 }
 0x3e3   :  { %1089 = vrcp.f32 %v849_v33  ;;  %941 = vmatpush.msrb.mxu3 %v925_v32  ;;  %v864_v47 = vand.u32 2147483648, %v849_v33  ;;  %v862_v49 = vand.u32 2147483647, %v849_v33  ;;  %vm858_vm4 = vweird.f32 %v849_v33 }
 0x3e5   :  { %v831_v1 = vpop.f32.mrf.mxu2  ;;  %942 = vmatpush.msrb.mxu3 %v924_v34  ;;  %v865_v61 = vor.u32 1.1754944e-38, %v864_v47  ;;  %vm863_vm6 = vcmp.eq.f32.partialorder %v862_v49, 8.507059e+37 }
 0x3e6   :  { %v1466_v36 = vadd.f32 %v831_v1, %v1422_v20 }
 0x3e7   :  { %943 = vmatpush.msrb.mxu3 %v923_v35 }
 0x3e8   :  { %v1088_v37 = vpop.eup %1087  ;;  %v1025_v39 = vmul.f32 -1.442695, %v1466_v36 }
 0x3e9   :  { %v1090_v0 = vpop.eup %1089  ;;  %v850_v28 = vadd.f32 1.0, %v1088_v37  ;;  %944 = vmatpush.msrb.mxu3 %v922_v38 }
 0x3ea   :  { %v854_v12 = vmul.f32 %v1090_v0, %v849_v33  ;;  %1091 = vpow2.f32 %v1025_v39  ;;  %vm859_vm14 = vweird.f32 %v1090_v0  ;;  %v1101_v39 = vld [vmem:[%s1532_s1] sm:$0x3f] }
 0x3eb   :  { %1093 = vrcp.f32 %v850_v28  ;;  %945 = vmatpush.msrb.mxu3 %v921_v40  ;;  %vm860_vm5 = vmor %vm858_vm4, %vm859_vm14  ;;  %v879_v9 = vand.u32 2147483648, %v850_v28  ;;  %v877_v13 = vand.u32 2147483647, %v850_v28  ;;  %vm873_vm8 = vweird.f32 %v850_v28 }
 0x3ec   :  { %v855_v44 = vsub.f32 1.0, %v854_v12  ;;  %v933_v40 = vperm.slane %v1101_v39, 5 }
 0x3ed   :  { %v834_v21 = vpop.f32.mrf.mxu2  ;;  %946 = vmatpush.msrb.mxu3 %v920_v43  ;;  %v880_v45 = vor.u32 1.1754944e-38, %v879_v9  ;;  %vm878_vm10 = vcmp.eq.f32.partialorder %v877_v13, 8.507059e+37 }
 0x3ee   :  { %v856_v48 = vmul.f32 %v1090_v0, %v855_v44  ;;  %v1482_v52 = vadd.f32 %v834_v21, %v1422_v20 }
 0x3ef   :  { %947 = vmatpush.msrb.mxu3 %v919_v46  ;;  %v1102_v46 = vld [vmem:[%s1530_s0] sm:$0xff] }
 0x3f0   :  { %v1092_v54 = vpop.eup %1091  ;;  %v857_v57 = vadd.f32 %v1090_v0, %v856_v48  ;;  %v1026_v58 = vmul.f32 -1.442695, %v1482_v52 }
 0x3f1   :  { %v1094_v60 = vpop.eup %1093  ;;  %v851_v50 = vadd.f32 1.0, %v1092_v54  ;;  %948 = vmatpush.msrb.mxu3 %v918_v53 }
 0x3f2   :  { %v861_v62 = vsel %vm860_vm5, %v1090_v0, %v857_v57  ;;  %1095 = vpow2.f32 %v1026_v58  ;;  %v869_v63 = vmul.f32 %v1094_v60, %v850_v28  ;;  %vm874_vm7 = vweird.f32 %v1094_v60  ;;  %v1103_v58 = vld [vmem:[%s1530_s0 + $0x8] sm:$0xff] }
 0x3f3   :  { %v866_v3 = vsel %vm863_vm6, %v865_v61, %v861_v62  ;;  %1097 = vrcp.f32 %v851_v50  ;;  %949 = vmatpush.msrb.mxu3 %v917_v59  ;;  %vm875_vm9 = vmor %vm873_vm8, %vm874_vm7  ;;  %v894_v22 = vand.u32 2147483648, %v851_v50  ;;  %v892_v29 = vand.u32 2147483647, %v851_v50 }
 0x3f4   :  { %v913_v7 = vmul.f32 %v866_v3, %v1432_v11  ;;  %v870_v8 = vsub.f32 1.0, %v869_v63  ;;  %vm888_vm12 = vweird.f32 %v851_v50  ;;  %v798_v28 = vperm.slane %v1101_v39, 3 }
 0x3f5   :  { %v895_v41 = vor.u32 1.1754944e-38, %v894_v22  ;;  %vm893_vm15 = vcmp.eq.f32.partialorder %v892_v29, 8.507059e+37 }
 0x3f6   :  { %950 = vmatmul.f32.vlgmr.msrb.gmra.mxu3 %v913_v7  ;;  %v871_v10 = vmul.f32 %v1094_v60, %v870_v8  ;;  %v1104_v7 = vld [vmem:[%s1530_s0 + $0x10] sm:$0xff] }
 0x3f8   :  { %v1096_v14 = vpop.eup %1095  ;;  %v872_v55 = vadd.f32 %v1094_v60, %v871_v10 }
 0x3f9   :  { %v1098_v4 = vpop.eup %1097  ;;  %v852_v56 = vadd.f32 1.0, %v1096_v14 }
 0x3fa   :  { %v876_v15 = vsel %vm875_vm9, %v1094_v60, %v872_v55  ;;  %v884_v16 = vmul.f32 %v1098_v4, %v851_v50  ;;  %vm889_vm11 = vweird.f32 %v1098_v4 }
 0x3fb   :  { %1099 = vrcp.f32 %v852_v56  ;;  %v881_v19 = vsel %vm878_vm10, %v880_v45, %v876_v15  ;;  %vm890_vm13 = vmor %vm888_vm12, %vm889_vm11  ;;  %v909_v25 = vand.u32 2147483648, %v852_v56  ;;  %vm903_vm2 = vweird.f32 %v852_v56  ;;  %v1105_v45 = vld [vmem:[%s1530_s0 + $0x18] sm:$0xff] }
 0x3fc   :  { %v914_v20 = vmul.f32 %v881_v19, %v1450_v27  ;;  %v885_v51 = vsub.f32 1.0, %v884_v16  ;;  %v907_v27 = vand.u32 2147483647, %v852_v56 }
 0x3fd   :  { %v910_v2 = vor.u32 1.1754944e-38, %v909_v25 }
 0x3fe   :  { %953 = vmatmul.f32.gmra.mxu3 %v914_v20  ;;  %v886_v30 = vmul.f32 %v1098_v4, %v885_v51  ;;  %vm908_vm14 = vcmp.eq.f32.partialorder %v907_v27, 8.507059e+37 }
 0x400   :  { %v887_v18 = vadd.f32 %v1098_v4, %v886_v30 }
 0x401   :  { %v1100_v11 = vpop.eup %1099 }
 0x402   :  { %v891_v42 = vsel %vm890_vm13, %v1098_v4, %v887_v18  ;;  %v899_v5 = vmul.f32 %v1100_v11, %v852_v56  ;;  %vm904_vm1 = vweird.f32 %v1100_v11 }
 0x403   :  { %v896_v6 = vsel %vm893_vm15, %v895_v41, %v891_v42  ;;  %vm905_vm3 = vmor %vm903_vm2, %vm904_vm1 }
 0x404   :  { %v915_v23 = vmul.f32 %v896_v6, %v1466_v36  ;;  %v900_v24 = vsub.f32 1.0, %v899_v5 }
 0x406   :  { %956 = vmatmul.f32.gmra.mxu3 %v915_v23  ;;  %v901_v26 = vmul.f32 %v1100_v11, %v900_v24 }
 0x408   :  { %v902_v17 = vadd.f32 %v1100_v11, %v901_v26 }
 0x40a   :  { %v906_v31 = vsel %vm905_vm3, %v1100_v11, %v902_v17 }
 0x40b   :  { %v911_v32 = vsel %vm908_vm14, %v910_v2, %v906_v31 }
 0x40c   :  { %v916_v33 = vmul.f32 %v911_v32, %v1482_v52 }
 0x40e   :  { %959 = vmatmul.f32.gmra.mxu3 %v916_v33 }
 0x424   :  { %v786_v37 = vpop.f32.mrf.mxu1 }
 0x42c   :  { %v789_v49 = vpop.f32.mrf.mxu1 }
 0x42e   :  { %v458_v34 = vpop.f32.mrf.mxu3 }
 0x42f   :  { %1017 = vmatmul.msk.f32.gmra.mxu1 %vm29_vm0, %v458_v34 }
 0x443   :  { %v745_v38 = vpop.f32.mrf.mxu0 }
 0x444   :  { %v787_v0 = vadd.f32 %v786_v37, %v745_v38 }
 0x446   :  { %v799_v44 = vadd.f32 %v798_v28, %v787_v0 }
 0x44b   :  { %v748_v21 = vpop.f32.mrf.mxu0 }
 0x44c   :  { %v790_v52 = vadd.f32 %v789_v49, %v748_v21 }
 0x44d   :  { %v461_v35 = vpop.f32.mrf.mxu3 }
 0x44e   :  { %1018 = vmatmul.msk.f32.gmra.mxu1 %vm29_vm0, %v461_v35  ;;  %v800_v57 = vadd.f32 %v798_v28, %v790_v52 }
 0x457   :  { %v710_v1 = vpop.f32.mrf.mxu3 }
 0x458   :  { %1013 = vmatmul.msk.f32.gmra.mxu0 %vm29_vm0, %v710_v1 }
 0x45f   :  { %v713_v36 = vpop.f32.mrf.mxu3 }
 0x460   :  { %1014 = vmatmul.msk.f32.gmra.mxu0 %vm29_vm0, %v713_v36 }
 0x479   :  { %v951_v12 = vpop.f32.mrf.mxu3 }
 0x47a   :  { %v952_v43 = vadd.f32 %v951_v12, %v933_v40 }
 0x47c   :  { %v963_v47 = vadd.f32 %v1102_v46, %v952_v43 }
 0x47e   :  { %v967_v48 = vadd.f32 %v963_v47, %v799_v44 }
 0x480   :  { %971 = vst.msk [vmem:[%s1536_s6] sm:$0xff] %vm29_vm0, %v967_v48 }
 0x481   :  { %v954_v53 = vpop.f32.mrf.mxu3 }
 0x482   :  { %v955_v54 = vadd.f32 %v954_v53, %v933_v40 }
 0x484   :  { %v964_v59 = vadd.f32 %v1103_v58, %v955_v54 }
 0x486   :  { %v968_v60 = vadd.f32 %v964_v59, %v800_v57 }
 0x488   :  { %972 = vst.msk [vmem:[%s1536_s6 + $0x8] sm:$0xff] %vm29_vm0, %v968_v60 }
 0x489   :  { %v957_v61 = vpop.f32.mrf.mxu3 }
 0x48a   :  { %v958_v50 = vadd.f32 %v957_v61, %v933_v40 }
 0x48c   :  { %v965_v8 = vadd.f32 %v1104_v7, %v958_v50 }
 0x491   :  { %v960_v10 = vpop.f32.mrf.mxu3 }
 0x492   :  { %v961_v14 = vadd.f32 %v960_v10, %v933_v40 }
 0x494   :  { %v966_v15 = vadd.f32 %v1105_v45, %v961_v14 }
 0x4ac   :  { %v792_v62 = vpop.f32.mrf.mxu1 }
 0x4cb   :  { %v795_v55 = vpop.f32.mrf.mxu1 }
 0x4d5   :  { %v751_v63 = vpop.f32.mrf.mxu0 }
 0x4d6   :  { %v793_v3 = vadd.f32 %v792_v62, %v751_v63 }
 0x4d8   :  { %v801_v9 = vadd.f32 %v798_v28, %v793_v3 }
 0x4da   :  { %v969_v13 = vadd.f32 %v965_v8, %v801_v9 }
 0x4dc   :  { %973 = vst.msk [vmem:[%s1536_s6 + $0x10] sm:$0xff] %vm29_vm0, %v969_v13 }
 0x4dd   :  { %v754_v4 = vpop.f32.mrf.mxu0 }
 0x4de   :  { %v796_v56 = vadd.f32 %v795_v55, %v754_v4 }
 0x4e0   :  { %v802_v16 = vadd.f32 %v798_v28, %v796_v56 }
 0x4e2   :  { %v970_v19 = vadd.f32 %v966_v15, %v802_v16 }
 0x4e4   :  { %974 = vst.msk [vmem:[%s1536_s6 + $0x18] sm:$0xff] %vm29_vm0, %v970_v19 }

</bundles_post_ra>
